<compile_context>
chip_gen: v7x
topology: tpu7x:2x2x1
jax: 0.10.0
libtpu: 0.0.40
codegen_flags: <defaults>
</compile_context>

<pallas_src>
import math

import numpy as np
import jax
import jax.numpy as jnp
from jax.experimental import pallas as pl
from jax.experimental.pallas import tpu as pltpu


_EXP_SCALE_K = 2  # scaling-and-squaring: exp(A) = exp(A / 2^k) ** (2^k)


def _build_fused_kernel(*, batch, latent_dim, group_dim, mat_block,
                        hy_rec, grp_const):
    """Fused forward kernel; all sizes / hypers are trace-time constants."""
    B, L, G, MB = batch, latent_dim, group_dim, mat_block

    def bmm(a, b):  # batched (B, MB, MB) matmul, f32 accumulate
        return jnp.einsum("bij,bjk->bik", a, b,
                          preferred_element_type=jnp.float32)

    def kernel(x_ref, eps_ref, wg_ref, bg_ref, wml_ref, bml_ref,
               basis_big_ref, sel_ref, wdec_big_ref, bdec_ref,
               out_ref, ge_ref, mu_ref, lv_ref, z_ref,
               rec_ref, kld_ref, grp_ref):
        # ---------------- encoder (linear stand-in) ----------------
        x = x_ref[...]                                               # (B, D) f32
        ge = jnp.dot(x.astype(jnp.bfloat16), wg_ref[...],            # bf16 MXU
                     preferred_element_type=jnp.float32) + bg_ref[...]
        # fused mu/logvar projection: one (G, 2L) matmul, slice the halves
        mulv = jnp.dot(ge, wml_ref[...],
                       preferred_element_type=jnp.float32) + bml_ref[...]
        mu = mulv[:, :L]
        lv = mulv[:, L:]
        z = mu + jnp.exp(0.5 * lv) * eps_ref[...]
        ge_ref[...] = ge
        mu_ref[...] = mu
        lv_ref[...] = lv
        z_ref[...] = z

        # ------- decoder: Lie-group exp of all subgroups at once -------
        # z -> flattened block-diagonal (MB x MB) Lie-algebra element.
        # basis_big already carries the 1/2^k pre-scale.
        a_flat = jnp.dot(z, basis_big_ref[...],
                         preferred_element_type=jnp.float32)         # (B, MB*MB)
        a = a_flat.reshape(B, MB, MB)
        eye = jnp.eye(MB, dtype=jnp.float32)[None, :, :]
        # degree-6 Taylor of exp(A/2^k), Paterson-Stockmeyer (3 matmuls) ...
        a2 = bmm(a, a)
        a3 = bmm(a2, a)
        low = eye + a + a2 * 0.5 + a3 * (1.0 / 6.0)
        high = a * (1.0 / 24.0) + a2 * (1.0 / 120.0) + a3 * (1.0 / 720.0)
        p = low + bmm(a3, high)
        # ... then raise to the 2^k-th power by repeated squaring.
        for _ in range(_EXP_SCALE_K):
            p = bmm(p, p)

        p_flat = p.reshape(B, MB * MB)
        # group_feats_D (compact layout) — only needed for the group-rec loss.
        gd = jnp.dot(p_flat, sel_ref[...],
                     preferred_element_type=jnp.float32)             # (B, G)
        # gfeat (linear stand-in): sel @ W_dec was folded outside the kernel, so
        # the output projection does not serialize behind the gd extraction.
        out = jnp.dot(p_flat.astype(jnp.bfloat16), wdec_big_ref[...],
                      preferred_element_type=jnp.float32) + bdec_ref[...]
        out_ref[...] = out

        # ---------------- losses (scalars -> SMEM) ----------------
        diff = out - x                                  # loss_fn = sum-of-squares
        rec_ref[0, 0] = jnp.sum(diff * diff) * (1.0 / float(B))
        kld_ref[0, 0] = jnp.mean(
            -0.5 * jnp.sum(1.0 + lv - mu * mu - jnp.exp(lv),
                           axis=-1, keepdims=True))
        gdiff = ge - gd
        grec = jnp.mean(jnp.sum(gdiff * gdiff, axis=1, keepdims=True))
        # grp_const = hy_hes * hessian_loss + hy_commute * commute_loss,
        # precomputed at __init__ (parameter-only, eval-mode module).
        grp_ref[0, 0] = grec * hy_rec + grp_const

    return kernel


class CommutativeVAEPallas:
    """Eval-mode CommutativeVAE forward, fused into one Pallas TPU kernel."""

    def __init__(self, params, subgroup_sizes_ls, subspace_sizes_ls,
                 hy_rec, hy_hes, hy_commute):
        self.params = params
        self.subgroup_sizes_ls = [int(v) for v in subgroup_sizes_ls]
        self.subspace_sizes_ls = [int(v) for v in subspace_sizes_ls]
        self.hy_rec = float(hy_rec)
        self.hy_hes = float(hy_hes)
        self.hy_commute = float(hy_commute)

        mat_dims = [int(math.isqrt(g)) for g in self.subgroup_sizes_ls]
        # TODO(synk): heterogeneous subgroup matrix sizes would need per-size
        #             batching of the Lie exp; provided configs are uniform.
        assert all(m == mat_dims[0] for m in mat_dims)
        self.mat_dim = mat_dims[0]
        self.n_sub = len(self.subgroup_sizes_ls)
        self.group_dim = sum(self.subgroup_sizes_ls)
        self.latent_dim = sum(self.subspace_sizes_ls)
        self.mat_block = self.n_sub * self.mat_dim          # MB

        self._consts = self._build_derived(params)
        self._grp_const = self._build_group_const(params)
        self._forward = jax.jit(self._forward_impl)

    # ---------- derived kernel operands (built ONCE, numpy, at init) ----------
    def _build_derived(self, params):
        L, G, M = self.latent_dim, self.group_dim, self.mat_dim
        n_sub, MB = self.n_sub, self.mat_block
        inv_scale = 1.0 / float(2 ** _EXP_SCALE_K)

        # 0/1 selection: flattened (MB x MB) diagonal-block entry -> compact
        # group-feature column (row-major within each subgroup block).
        sel_np = np.zeros((MB * MB, G), np.float32)
        for k in range(n_sub):
            for a in range(M):
                for c in range(M):
                    sel_np[(k * M + a) * MB + (k * M + c),
                           k * M * M + a * M + c] = 1.0

        # z -> flattened block-diagonal Lie-algebra element, with the 1/2^k
        # scaling-and-squaring pre-scale folded in.
        basis_flat = np.zeros((L, G), np.float32)
        r0, c0 = 0, 0
        for k, s in enumerate(self.subspace_sizes_ls):
            bk = np.asarray(params["lie_alg_basis"][k], np.float32)   # (s, M, M)
            basis_flat[r0:r0 + s, c0:c0 + M * M] = bk.reshape(s, M * M)
            r0 += s
            c0 += M * M
        basis_big_np = (basis_flat @ sel_np.T) * inv_scale            # (L, MB*MB)

        w_mulv = np.concatenate([np.asarray(params["W_mu"], np.float32),
                                 np.asarray(params["W_lv"], np.float32)], axis=1)
        b_mulv = np.concatenate([np.asarray(params["b_mu"], np.float32),
                                 np.asarray(params["b_lv"], np.float32)], axis=1)
        # Fold the diag-block selection into the decoder weight: (MB*MB, D).
        wdec_big_np = sel_np @ np.asarray(params["W_dec"], np.float32)

        return {
            "wg": jnp.asarray(params["W_g"]).astype(jnp.bfloat16),
            "bg": jnp.asarray(params["b_g"], jnp.float32),
            "wml": jnp.asarray(w_mulv),
            "bml": jnp.asarray(b_mulv),
            "basis_big": jnp.asarray(basis_big_np),
            "sel": jnp.asarray(sel_np),
            "wdec_big": jnp.asarray(wdec_big_np).astype(jnp.bfloat16),
            "bdec": jnp.asarray(params["b_dec"], jnp.float32),
        }

    # ---- parameter-only basis losses, computed once (reference formulas) ----
    def _build_group_const(self, params):
        hes, com = 0.0, 0.0
        for k, s in enumerate(self.subspace_sizes_ls):
            if s > 1:
                bk = np.asarray(params["lie_alg_basis"][k], np.float32)  # (s,M,M)
                # mul_ij[i, j] = basis[j] @ basis[i]   (reference calc_basis_mul_ij)
                outer = np.einsum("jab,ibc->ijac", bk, bk)
                mask = (1.0 - np.eye(s, dtype=np.float32))[:, :, None, None]
                mul_ij = outer * mask
                hes += float(np.mean(np.sum(mul_ij ** 2, axis=(2, 3))))
                commut = mul_ij - np.transpose(mul_ij, (0, 1, 3, 2))
                com += float(np.mean(np.sum(commut ** 2, axis=(2, 3))))
        return float(self.hy_hes * hes + self.hy_commute * com)

    # --------------------------------- forward --------------------------------
    def _forward_impl(self, consts, x, eps):
        B, C, H, W = x.shape
        D = C * H * W
        G, L, MB = self.group_dim, self.latent_dim, self.mat_block
        x_flat = x.reshape(B, D).astype(jnp.float32)

        kernel = _build_fused_kernel(
            batch=B, latent_dim=L, group_dim=G, mat_block=MB,
            hy_rec=self.hy_rec, grp_const=self._grp_const)

        flops = (2 * B * D * G + 2 * B * G * (2 * L) + 2 * B * L * (MB * MB)
                 + 2 * (3 + _EXP_SCALE_K) * B * MB * MB * MB
                 + 2 * B * (MB * MB) * G + 2 * B * (MB * MB) * D)
        bytes_accessed = (4 * (2 * B * D + B * G + 3 * B * L + B * L)
                          + 2 * (D * G + MB * MB * D)
                          + 4 * (G * 2 * L + L * MB * MB + MB * MB * G + G + 2 * L + D))
        cost = pl.CostEstimate(flops=int(flops), transcendentals=int(2 * B * L),
                               bytes_accessed=int(bytes_accessed))

        vmem = pl.BlockSpec(memory_space=pltpu.MemorySpace.VMEM)
        smem = pl.BlockSpec(memory_space=pltpu.MemorySpace.SMEM)

        out_flat, ge, mu, logvar, z, rec, kld, grp = pl.pallas_call(
            kernel,
            out_shape=(
                jax.ShapeDtypeStruct((B, D), jnp.float32),     # x_hat
                jax.ShapeDtypeStruct((B, G), jnp.float32),     # group_feats_E
                jax.ShapeDtypeStruct((B, L), jnp.float32),     # mu
                jax.ShapeDtypeStruct((B, L), jnp.float32),     # logvar
                jax.ShapeDtypeStruct((B, L), jnp.float32),     # z
                jax.ShapeDtypeStruct((1, 1), jnp.float32),     # reconst
                jax.ShapeDtypeStruct((1, 1), jnp.float32),     # kld
                jax.ShapeDtypeStruct((1, 1), jnp.float32),     # group
            ),
            in_specs=[vmem] * 10,
            out_specs=(vmem, vmem, vmem, vmem, vmem, smem, smem, smem),
            cost_estimate=cost,
        )(x_flat, eps, consts["wg"], consts["bg"], consts["wml"], consts["bml"],
          consts["basis_big"], consts["sel"], consts["wdec_big"], consts["bdec"])

        enc_output = (z, mu, logvar, ge)
        # NOTE: reference computes x_eg_hat / x_gg_hat too, but they are dead in
        # the eval path (and x_gg_hat == output for the linear stand-in decoder),
        # so they are elided here.
        result = {
            "elbo": {},
            "obj": {
                "reconst": rec.reshape(1),
                "kld": kld.reshape(1),
                "group": grp.reshape(1),
            },
            "id": {},
        }
        output = out_flat.reshape(B, C, H, W)
        return result, enc_output, output

    def __call__(self, x, eps):
        return self._forward(self._consts, x, eps)


def init_params(key, in_dim, subgroup_sizes_ls, subspace_sizes_ls):
    G = sum(subgroup_sizes_ls)
    L = sum(subspace_sizes_ls)
    keys = jax.random.split(key, 4 + len(subspace_sizes_ls))
    scale = lambda fan_in: 1.0 / math.sqrt(fan_in)
    params = {
        "W_g": jax.random.normal(keys[0], (in_dim, G), jnp.float32) * scale(in_dim),
        "b_g": jnp.zeros((1, G), jnp.float32),
        "W_mu": jax.random.normal(keys[1], (G, L), jnp.float32) * scale(G),
        "b_mu": jnp.zeros((1, L), jnp.float32),
        "W_lv": jax.random.normal(keys[2], (G, L), jnp.float32) * scale(G),
        "b_lv": jnp.zeros((1, L), jnp.float32),
        "W_dec": jax.random.normal(keys[3], (G, in_dim), jnp.float32) * scale(G),
        "b_dec": jnp.zeros((1, in_dim), jnp.float32),
    }
    basis_list = []
    for i, s in enumerate(subspace_sizes_ls):
        m = int(math.isqrt(subgroup_sizes_ls[i]))
        basis_list.append(
            jax.random.normal(keys[4 + i], (s, m, m), jnp.float32) * 0.1)
    params["lie_alg_basis"] = basis_list
    return params


if __name__ == "__main__":
    # small config consistent with the module
    B, C, H, W = 2, 4, 16, 16
    subgroup_sizes_ls = [16, 16]      # each subgroup is a 4x4 matrix group
    subspace_sizes_ls = [4, 4]        # latent dims per subgroup
    hy_rec, hy_hes, hy_commute = 0.1, 40.0, 20.0

    key = jax.random.PRNGKey(0)
    k_x, k_p, k_eps = jax.random.split(key, 3)
    x = jax.random.normal(k_x, (B, C, H, W), jnp.float32)
    params = init_params(k_p, C * H * W, subgroup_sizes_ls, subspace_sizes_ls)
    eps = jax.random.normal(k_eps, (B, sum(subspace_sizes_ls)), jnp.float32)

    model = CommutativeVAEPallas(params, subgroup_sizes_ls, subspace_sizes_ls,
                                 hy_rec, hy_hes, hy_commute)
    result, enc_output, output = model(x, eps)
    jax.block_until_ready((result, enc_output, output))
    print("KERNEL_OK")
</pallas_src>

<mosaic_0001>
module attributes {stable_mosaic.version = 11 : i64} {
  func.func @kernel(%arg0: memref<2x1024xf32, #tpu.memory_space<vmem>>, %arg1: memref<2x8xf32, #tpu.memory_space<vmem>>, %arg2: memref<1024x32xbf16, #tpu.memory_space<vmem>>, %arg3: memref<1x32xf32, #tpu.memory_space<vmem>>, %arg4: memref<32x16xf32, #tpu.memory_space<vmem>>, %arg5: memref<1x16xf32, #tpu.memory_space<vmem>>, %arg6: memref<8x64xf32, #tpu.memory_space<vmem>>, %arg7: memref<64x32xf32, #tpu.memory_space<vmem>>, %arg8: memref<64x1024xbf16, #tpu.memory_space<vmem>>, %arg9: memref<1x1024xf32, #tpu.memory_space<vmem>>, %arg10: memref<2x1024xf32, #tpu.memory_space<vmem>>, %arg11: memref<2x32xf32, #tpu.memory_space<vmem>>, %arg12: memref<2x8xf32, #tpu.memory_space<vmem>>, %arg13: memref<2x8xf32, #tpu.memory_space<vmem>>, %arg14: memref<2x8xf32, #tpu.memory_space<vmem>>, %arg15: memref<1x1xf32, #tpu.memory_space<smem>>, %arg16: memref<1x1xf32, #tpu.memory_space<smem>>, %arg17: memref<1x1xf32, #tpu.memory_space<smem>>) attributes {dimension_semantics = [], scalar_prefetch = 0 : i64, scratch_operands = 0 : i64, tpu.core_type = #tpu.core_type<tc>} {
    %c0 = arith.constant 0 : index
    %c0_0 = arith.constant 0 : index
    %0 = vector.load %arg0[%c0, %c0_0] : memref<2x1024xf32, #tpu.memory_space<vmem>>, vector<2x1024xf32>
    %1 = arith.truncf %0 : vector<2x1024xf32> to vector<2x1024xbf16>
    %c0_1 = arith.constant 0 : index
    %c0_2 = arith.constant 0 : index
    %2 = vector.load %arg2[%c0_1, %c0_2] : memref<1024x32xbf16, #tpu.memory_space<vmem>>, vector<1024x32xbf16>
    %cst = arith.constant dense<0.000000e+00> : vector<2x32xf32>
    %3 = tpu.matmul %1, %2, %cst {dimension_numbers = #tpu.dot_dimension_numbers<[1], [0], [0], [1], [0, 0, 1, 1], [], []>} : vector<2x1024xbf16>, vector<1024x32xbf16>, vector<2x32xf32> -> vector<2x32xf32>
    %c0_3 = arith.constant 0 : index
    %c0_4 = arith.constant 0 : index
    %4 = vector.load %arg3[%c0_3, %c0_4] : memref<1x32xf32, #tpu.memory_space<vmem>>, vector<1x32xf32>
    %5 = vector.broadcast %4 : vector<1x32xf32> to vector<2x32xf32>
    %6 = arith.addf %3, %5 : vector<2x32xf32>
    %c0_5 = arith.constant 0 : index
    %c0_6 = arith.constant 0 : index
    %7 = vector.load %arg4[%c0_5, %c0_6] : memref<32x16xf32, #tpu.memory_space<vmem>>, vector<32x16xf32>
    %cst_7 = arith.constant dense<0.000000e+00> : vector<2x16xf32>
    %8 = tpu.matmul %6, %7, %cst_7 {dimension_numbers = #tpu.dot_dimension_numbers<[1], [0], [0], [1], [0, 0, 1, 1], [], []>} : vector<2x32xf32>, vector<32x16xf32>, vector<2x16xf32> -> vector<2x16xf32>
    %c0_8 = arith.constant 0 : index
    %c0_9 = arith.constant 0 : index
    %9 = vector.load %arg5[%c0_8, %c0_9] : memref<1x16xf32, #tpu.memory_space<vmem>>, vector<1x16xf32>
    %10 = vector.broadcast %9 : vector<1x16xf32> to vector<2x16xf32>
    %11 = arith.addf %8, %10 : vector<2x16xf32>
    %12 = vector.extract_strided_slice %11 {offsets = [0, 0], sizes = [2, 8], strides = [1, 1]} : vector<2x16xf32> to vector<2x8xf32>
    %13 = vector.extract_strided_slice %11 {offsets = [0, 8], sizes = [2, 8], strides = [1, 1]} : vector<2x16xf32> to vector<2x8xf32>
    %cst_10 = arith.constant 5.000000e-01 : f32
    %14 = vector.broadcast %cst_10 : f32 to vector<2x8xf32>
    %15 = arith.mulf %14, %13 : vector<2x8xf32>
    %16 = math.exp %15 : vector<2x8xf32>
    %c0_11 = arith.constant 0 : index
    %c0_12 = arith.constant 0 : index
    %17 = vector.load %arg1[%c0_11, %c0_12] : memref<2x8xf32, #tpu.memory_space<vmem>>, vector<2x8xf32>
    %18 = arith.mulf %16, %17 : vector<2x8xf32>
    %19 = arith.addf %12, %18 : vector<2x8xf32>
    %c0_13 = arith.constant 0 : index
    %c0_14 = arith.constant 0 : index
    %20 = vector.load %arg11[%c0_13, %c0_14] : memref<2x32xf32, #tpu.memory_space<vmem>>, vector<2x32xf32>
    tpu.vector_store %arg11[%c0_13, %c0_14], %6 {strides = array<i32>} : memref<2x32xf32, #tpu.memory_space<vmem>>, vector<2x32xf32>,
    %c0_15 = arith.constant 0 : index
    %c0_16 = arith.constant 0 : index
    %21 = vector.load %arg12[%c0_15, %c0_16] : memref<2x8xf32, #tpu.memory_space<vmem>>, vector<2x8xf32>
    tpu.vector_store %arg12[%c0_15, %c0_16], %12 {strides = array<i32>} : memref<2x8xf32, #tpu.memory_space<vmem>>, vector<2x8xf32>,
    %c0_17 = arith.constant 0 : index
    %c0_18 = arith.constant 0 : index
    %22 = vector.load %arg13[%c0_17, %c0_18] : memref<2x8xf32, #tpu.memory_space<vmem>>, vector<2x8xf32>
    tpu.vector_store %arg13[%c0_17, %c0_18], %13 {strides = array<i32>} : memref<2x8xf32, #tpu.memory_space<vmem>>, vector<2x8xf32>,
    %c0_19 = arith.constant 0 : index
    %c0_20 = arith.constant 0 : index
    %23 = vector.load %arg14[%c0_19, %c0_20] : memref<2x8xf32, #tpu.memory_space<vmem>>, vector<2x8xf32>
    tpu.vector_store %arg14[%c0_19, %c0_20], %19 {strides = array<i32>} : memref<2x8xf32, #tpu.memory_space<vmem>>, vector<2x8xf32>,
    %c0_21 = arith.constant 0 : index
    %c0_22 = arith.constant 0 : index
    %24 = vector.load %arg6[%c0_21, %c0_22] : memref<8x64xf32, #tpu.memory_space<vmem>>, vector<8x64xf32>
    %cst_23 = arith.constant dense<0.000000e+00> : vector<2x64xf32>
    %25 = tpu.matmul %19, %24, %cst_23 {dimension_numbers = #tpu.dot_dimension_numbers<[1], [0], [0], [1], [0, 0, 1, 1], [], []>} : vector<2x8xf32>, vector<8x64xf32>, vector<2x64xf32> -> vector<2x64xf32>
    %26 = vector.shape_cast %25 : vector<2x64xf32> to vector<2x8x8xf32>
    %27 = tpu.iota {dimensions = array<i32: 0>} : vector<8x8xi32>
    %28 = tpu.iota {dimensions = array<i32: 1>} : vector<8x8xi32>
    %c0_i32 = arith.constant 0 : i32
    %29 = vector.broadcast %c0_i32 : i32 to vector<8x8xi32>
    %30 = arith.addi %27, %29 : vector<8x8xi32>
    %31 = arith.cmpi eq, %30, %28 : vector<8x8xi32>
    %32 = arith.extui %31 : vector<8x8xi1> to vector<8x8xi32>
    %33 = arith.sitofp %32 : vector<8x8xi32> to vector<8x8xf32>
    %34 = vector.shape_cast %33 : vector<8x8xf32> to vector<1x8x8xf32>
    "tpu.trace_start"() <{level = 10 : i32, message = "bij,bjk->bik"}> : () -> ()
    %cst_24 = arith.constant dense<0.000000e+00> : vector<2x8x8xf32>
    %35 = tpu.matmul %26, %26, %cst_24 {dimension_numbers = #tpu.dot_dimension_numbers<[2], [1], [1], [2], [0, 0, 0, 1, 1, 2], [0], [0]>} : vector<2x8x8xf32>, vector<2x8x8xf32>, vector<2x8x8xf32> -> vector<2x8x8xf32>
    %cst_25 = arith.constant dense<0.000000e+00> : vector<2x8x8xf32>
    %36 = tpu.matmul %35, %26, %cst_25 {dimension_numbers = #tpu.dot_dimension_numbers<[2], [1], [1], [2], [0, 0, 0, 1, 1, 2], [0], [0]>} : vector<2x8x8xf32>, vector<2x8x8xf32>, vector<2x8x8xf32> -> vector<2x8x8xf32>
    "tpu.trace_stop"() : () -> ()
    %37 = vector.broadcast %34 : vector<1x8x8xf32> to vector<2x8x8xf32>
    %38 = arith.addf %37, %26 : vector<2x8x8xf32>
    %cst_26 = arith.constant 5.000000e-01 : f32
    %39 = vector.broadcast %cst_26 : f32 to vector<2x8x8xf32>
    %40 = arith.mulf %35, %39 : vector<2x8x8xf32>
    %41 = arith.addf %38, %40 : vector<2x8x8xf32>
    %cst_27 = arith.constant 0.166666672 : f32
    %42 = vector.broadcast %cst_27 : f32 to vector<2x8x8xf32>
    %43 = arith.mulf %36, %42 : vector<2x8x8xf32>
    %44 = arith.addf %41, %43 : vector<2x8x8xf32>
    %cst_28 = arith.constant 0.0416666679 : f32
    %45 = vector.broadcast %cst_28 : f32 to vector<2x8x8xf32>
    %46 = arith.mulf %26, %45 : vector<2x8x8xf32>
    %cst_29 = arith.constant 0.00833333377 : f32
    %47 = vector.broadcast %cst_29 : f32 to vector<2x8x8xf32>
    %48 = arith.mulf %35, %47 : vector<2x8x8xf32>
    %49 = arith.addf %46, %48 : vector<2x8x8xf32>
    %cst_30 = arith.constant 0.00138888892 : f32
    %50 = vector.broadcast %cst_30 : f32 to vector<2x8x8xf32>
    %51 = arith.mulf %36, %50 : vector<2x8x8xf32>
    %52 = arith.addf %49, %51 : vector<2x8x8xf32>
    "tpu.trace_start"() <{level = 10 : i32, message = "bij,bjk->bik"}> : () -> ()
    %cst_31 = arith.constant dense<0.000000e+00> : vector<2x8x8xf32>
    %53 = tpu.matmul %36, %52, %cst_31 {dimension_numbers = #tpu.dot_dimension_numbers<[2], [1], [1], [2], [0, 0, 0, 1, 1, 2], [0], [0]>} : vector<2x8x8xf32>, vector<2x8x8xf32>, vector<2x8x8xf32> -> vector<2x8x8xf32>
    "tpu.trace_stop"() : () -> ()
    %54 = arith.addf %44, %53 : vector<2x8x8xf32>
    "tpu.trace_start"() <{level = 10 : i32, message = "bij,bjk->bik"}> : () -> ()
    %cst_32 = arith.constant dense<0.000000e+00> : vector<2x8x8xf32>
    %55 = tpu.matmul %54, %54, %cst_32 {dimension_numbers = #tpu.dot_dimension_numbers<[2], [1], [1], [2], [0, 0, 0, 1, 1, 2], [0], [0]>} : vector<2x8x8xf32>, vector<2x8x8xf32>, vector<2x8x8xf32> -> vector<2x8x8xf32>
    %cst_33 = arith.constant dense<0.000000e+00> : vector<2x8x8xf32>
    %56 = tpu.matmul %55, %55, %cst_33 {dimension_numbers = #tpu.dot_dimension_numbers<[2], [1], [1], [2], [0, 0, 0, 1, 1, 2], [0], [0]>} : vector<2x8x8xf32>, vector<2x8x8xf32>, vector<2x8x8xf32> -> vector<2x8x8xf32>
    "tpu.trace_stop"() : () -> ()
    %57 = vector.shape_cast %56 : vector<2x8x8xf32> to vector<2x64xf32>
    %c0_34 = arith.constant 0 : index
    %c0_35 = arith.constant 0 : index
    %58 = vector.load %arg7[%c0_34, %c0_35] : memref<64x32xf32, #tpu.memory_space<vmem>>, vector<64x32xf32>
    %cst_36 = arith.constant dense<0.000000e+00> : vector<2x32xf32>
    %59 = tpu.matmul %57, %58, %cst_36 {dimension_numbers = #tpu.dot_dimension_numbers<[1], [0], [0], [1], [0, 0, 1, 1], [], []>} : vector<2x64xf32>, vector<64x32xf32>, vector<2x32xf32> -> vector<2x32xf32>
    %60 = arith.truncf %57 : vector<2x64xf32> to vector<2x64xbf16>
    %c0_37 = arith.constant 0 : index
    %c0_38 = arith.constant 0 : index
    %61 = vector.load %arg8[%c0_37, %c0_38] : memref<64x1024xbf16, #tpu.memory_space<vmem>>, vector<64x1024xbf16>
    %cst_39 = arith.constant dense<0.000000e+00> : vector<2x1024xf32>
    %62 = tpu.matmul %60, %61, %cst_39 {dimension_numbers = #tpu.dot_dimension_numbers<[1], [0], [0], [1], [0, 0, 1, 1], [], []>} : vector<2x64xbf16>, vector<64x1024xbf16>, vector<2x1024xf32> -> vector<2x1024xf32>
    %c0_40 = arith.constant 0 : index
    %c0_41 = arith.constant 0 : index
    %63 = vector.load %arg9[%c0_40, %c0_41] : memref<1x1024xf32, #tpu.memory_space<vmem>>, vector<1x1024xf32>
    %64 = vector.broadcast %63 : vector<1x1024xf32> to vector<2x1024xf32>
    %65 = arith.addf %62, %64 : vector<2x1024xf32>
    %c0_42 = arith.constant 0 : index
    %c0_43 = arith.constant 0 : index
    %66 = vector.load %arg10[%c0_42, %c0_43] : memref<2x1024xf32, #tpu.memory_space<vmem>>, vector<2x1024xf32>
    tpu.vector_store %arg10[%c0_42, %c0_43], %65 {strides = array<i32>} : memref<2x1024xf32, #tpu.memory_space<vmem>>, vector<2x1024xf32>,
    %67 = arith.subf %65, %0 : vector<2x1024xf32>
    %68 = arith.mulf %67, %67 : vector<2x1024xf32>
    %69 = vector.shape_cast %68 : vector<2x1024xf32> to vector<1x2x1024xf32>
    %cst_44 = arith.constant dense<0.000000e+00> : vector<1xf32>
    %70 = vector.multi_reduction <add>, %69, %cst_44 [1, 2] : vector<1x2x1024xf32> to vector<1xf32>
    %71 = vector.shape_cast %70 : vector<1xf32> to vector<1x1x1xf32>
    %72 = vector.extract %71[0, 0, 0] : f32 from vector<1x1x1xf32>
    %cst_45 = arith.constant 5.000000e-01 : f32
    %73 = arith.mulf %72, %cst_45 : f32
    %c0_46 = arith.constant 0 : index
    %c0_47 = arith.constant 0 : index
    %74 = memref.load %arg15[%c0_46, %c0_47] : memref<1x1xf32, #tpu.memory_space<smem>>
    memref.store %73, %arg15[%c0_46, %c0_47] : memref<1x1xf32, #tpu.memory_space<smem>>
    %cst_48 = arith.constant 1.000000e+00 : f32
    %75 = vector.broadcast %cst_48 : f32 to vector<2x8xf32>
    %76 = arith.addf %75, %13 : vector<2x8xf32>
    %77 = arith.mulf %12, %12 : vector<2x8xf32>
    %78 = arith.subf %76, %77 : vector<2x8xf32>
    %79 = math.exp %13 : vector<2x8xf32>
    %80 = arith.subf %78, %79 : vector<2x8xf32>
    %cst_49 = arith.constant dense<0.000000e+00> : vector<2xf32>
    %81 = vector.multi_reduction <add>, %80, %cst_49 [1] : vector<2x8xf32> to vector<2xf32>
    %82 = vector.shape_cast %81 : vector<2xf32> to vector<2x1xf32>
    %cst_50 = arith.constant -5.000000e-01 : f32
    %83 = vector.broadcast %cst_50 : f32 to vector<2x1xf32>
    %84 = arith.mulf %83, %82 : vector<2x1xf32>
    %85 = vector.shape_cast %84 : vector<2x1xf32> to vector<1x2x1xf32>
    %cst_51 = arith.constant dense<0.000000e+00> : vector<1xf32>
    %86 = vector.multi_reduction <add>, %85, %cst_51 [1, 2] : vector<1x2x1xf32> to vector<1xf32>
    %87 = vector.shape_cast %86 : vector<1xf32> to vector<1x1x1xf32>
    %88 = vector.extract %87[0, 0, 0] : f32 from vector<1x1x1xf32>
    %cst_52 = arith.constant 2.000000e+00 : f32
    %89 = arith.divf %88, %cst_52 : f32
    %c0_53 = arith.constant 0 : index
    %c0_54 = arith.constant 0 : index
    %90 = memref.load %arg16[%c0_53, %c0_54] : memref<1x1xf32, #tpu.memory_space<smem>>
    memref.store %89, %arg16[%c0_53, %c0_54] : memref<1x1xf32, #tpu.memory_space<smem>>
    %91 = arith.subf %6, %59 : vector<2x32xf32>
    %92 = arith.mulf %91, %91 : vector<2x32xf32>
    %cst_55 = arith.constant dense<0.000000e+00> : vector<2xf32>
    %93 = vector.multi_reduction <add>, %92, %cst_55 [1] : vector<2x32xf32> to vector<2xf32>
    %94 = vector.shape_cast %93 : vector<2xf32> to vector<2x1xf32>
    %95 = vector.shape_cast %94 : vector<2x1xf32> to vector<1x2x1xf32>
    %cst_56 = arith.constant dense<0.000000e+00> : vector<1xf32>
    %96 = vector.multi_reduction <add>, %95, %cst_56 [1, 2] : vector<1x2x1xf32> to vector<1xf32>
    %97 = vector.shape_cast %96 : vector<1xf32> to vector<1x1x1xf32>
    %98 = vector.extract %97[0, 0, 0] : f32 from vector<1x1x1xf32>
    %cst_57 = arith.constant 2.000000e+00 : f32
    %99 = arith.divf %98, %cst_57 : f32
    %cst_58 = arith.constant 1.000000e-01 : f32
    %100 = arith.mulf %99, %cst_58 : f32
    %cst_59 = arith.constant 0.864180326 : f32
    %101 = arith.addf %100, %cst_59 : f32
    %c0_60 = arith.constant 0 : index
    %c0_61 = arith.constant 0 : index
    %102 = memref.load %arg17[%c0_60, %c0_61] : memref<1x1xf32, #tpu.memory_space<smem>>
    memref.store %101, %arg17[%c0_60, %c0_61] : memref<1x1xf32, #tpu.memory_space<smem>>
    return
  }
}

</mosaic_0001>

<bundles_post_ra>
// kernel: _forward_impl.1
= control target key start
LH: loop header
LB: loop body
LE: loop exit
PB: predicated region body
PF: predicated region fallthrough
CT: control target
= control target key end

     0   :  { %s3990_s0 = inlined_call_operand.vmem [shape: f32[2,1024], index: 0, kind: input, shape index: {}]   ;;  %s3991_s1 = inlined_call_operand.vmem [shape: f32[2,8], index: 1, kind: input, shape index: {}]   ;;  %s3992_s2 = inlined_call_operand.vmem [shape: bf16[1024,32], index: 2, kind: input, shape index: {}]   ;;  %s3993_s3 = inlined_call_operand.vmem [shape: f32[1,32], index: 3, kind: input, shape index: {}]   ;;  %s3994_s4 = inlined_call_operand.vmem [shape: f32[32,16], index: 4, kind: input, shape index: {}]   ;;  %s3995_s5 = inlined_call_operand.vmem [shape: f32[1,16], index: 5, kind: input, shape index: {}]   ;;  %s3996_s6 = inlined_call_operand.vmem [shape: f32[8,64], index: 6, kind: input, shape index: {}]   ;;  %s3997_s7 = inlined_call_operand.vmem [shape: f32[64,32], index: 7, kind: input, shape index: {}]   ;;  %s3998_s8 = inlined_call_operand.vmem [shape: bf16[64,1024], index: 8, kind: input, shape index: {}]   ;;  %s3999_s9 = inlined_call_operand.vmem [shape: f32[1,1024], index: 9, kind: input, shape index: {}]   ;;  %s4000_s10 = inlined_call_operand.vmem [shape: f32[2,1024], index: 10, kind: output, shape index: {0}]   ;;  %s4001_s11 = inlined_call_operand.hbm [shape: f32[2,32], index: 11, kind: output, shape index: {1}]   ;;  %s4002_s12 = inlined_call_operand.hbm [shape: f32[2,8], index: 12, kind: output, shape index: {2}]   ;;  %s4003_s13 = inlined_call_operand.hbm [shape: f32[2,8], index: 13, kind: output, shape index: {3}]   ;;  %s4004_s14 = inlined_call_operand.hbm [shape: f32[2,8], index: 14, kind: output, shape index: {4}]   ;;  %s4005_s15 = inlined_call_operand.hbm [shape: f32[1,1], index: 15, kind: output, shape index: {5}]   ;;  %s4006_s16 = inlined_call_operand.hbm [shape: f32[1,1], index: 16, kind: output, shape index: {6}]   ;;  %s4007_s17 = inlined_call_operand.hbm [shape: f32[1,1], index: 17, kind: output, shape index: {7}]  }
   0x1   :  { %4009 = sst [smem:[#allocation19_spill]] %s3990_s0 }
   0x2   :  { %4010 = sst [smem:[#allocation20_spill]] %s3991_s1 }
   0x3   :  { %23 = vsyncpa [#allocation3], 0 }
   0x4   :  { %24 = vsyncpa [#allocation6], 0 }
   0x5   :  { %25 = vsyncpa [#allocation9], 0 }
   0x6   :  { %26 = vsyncpa [#allocation4], 0  ;;  %v3004_v0 = vld [vmem:[%s3992_s2 + $0x40] sm:$0xff]   ;;  %v3008_v4 = vld [vmem:[%s3992_s2 + $0x48] sm:$0xff]   ;;  %v57_v28 = vlaneseq  ;;  %s4011_s0 = sld [smem:[#allocation19_spill]] }
   0x7   :  { %v3005_v1 = vld [vmem:[%s3992_s2 + $0xc0] sm:$0xff]   ;;  %2744 = vmatprep.subr.bf16.mxu0 %v3004_v0  ;;  %v3009_v5 = vld [vmem:[%s3992_s2 + $0xc8] sm:$0xff]   ;;  %v3012_v8 = vld [vmem:[%s3992_s2 + $0x50] sm:$0xff]   ;;  %v3202_v36 = vmov 1983009808  }
   0x8   :  { %v3006_v2 = vld [vmem:[%s3992_s2] sm:$0xff]   ;;  %2766 = vmatprep.subr.bf16.mxu1 %v3005_v1  ;;  %v3010_v6 = vld [vmem:[%s3992_s2 + $0x8] sm:$0xff]   ;;  %v3013_v9 = vld [vmem:[%s3992_s2 + $0xd0] sm:$0xff]   ;;  %v3416_v33 = vshrl.u32 %v57_v28, 7  ;;  %v55_v37 = vunpack.c.l.s4 %v3202_v36 }
   0x9   :  { %v3007_v3 = vld [vmem:[%s3992_s2 + $0x80] sm:$0xff]   ;;  %2745 = vmatpush3.bf16.msra.mxu0 %v3006_v2  ;;  %v3011_v7 = vld [vmem:[%s3992_s2 + $0x88] sm:$0xff]   ;;  %v3014_v10 = vld [vmem:[%s3992_s2 + $0x10] sm:$0xff]  }
   0xa   :  { %2767 = vmatpush3.bf16.msra.mxu1 %v3007_v3  ;;  %2746 = vmatprep.subr.bf16.mxu0 %v3008_v4  ;;  %v3015_v11 = vld [vmem:[%s3992_s2 + $0x90] sm:$0xff]   ;;  %v3016_v12 = vld [vmem:[%s3992_s2 + $0x58] sm:$0xff]   ;;  %v3020_v16 = vld [vmem:[%s3992_s2 + $0x60] sm:$0xff]   ;;  %v56_v39 = vunpack.c.0.s8 %v55_v37 }
   0xb   :  { %2768 = vmatprep.subr.bf16.mxu1 %v3009_v5  ;;  %v3017_v13 = vld [vmem:[%s3992_s2 + $0xd8] sm:$0xff]   ;;  %v3021_v17 = vld [vmem:[%s3992_s2 + $0xe0] sm:$0xff]   ;;  %v3024_v20 = vld [vmem:[%s3992_s2 + $0x68] sm:$0xff]  }
   0xc   :  { %v3018_v14 = vld [vmem:[%s3992_s2 + $0x18] sm:$0xff]   ;;  %v3022_v18 = vld [vmem:[%s3992_s2 + $0x20] sm:$0xff]   ;;  %v3025_v21 = vld [vmem:[%s3992_s2 + $0xe8] sm:$0xff]   ;;  %v3428_v41 = vsub.s32 %v56_v39, %v3416_v33 }
   0xd   :  { %2747 = vmatpush3.bf16.msra.mxu0 %v3010_v6  ;;  %v3019_v15 = vld [vmem:[%s3992_s2 + $0x98] sm:$0xff]   ;;  %v3023_v19 = vld [vmem:[%s3992_s2 + $0xa0] sm:$0xff]   ;;  %v3026_v22 = vld [vmem:[%s3992_s2 + $0x28] sm:$0xff]  }
   0xe   :  { %2769 = vmatpush3.bf16.msra.mxu1 %v3011_v7  ;;  %2748 = vmatprep.subr.bf16.mxu0 %v3012_v8  ;;  %v3027_v23 = vld [vmem:[%s3992_s2 + $0xa8] sm:$0xff]   ;;  %v3028_v24 = vld [vmem:[%s3992_s2 + $0x70] sm:$0xff]   ;;  %v3032_v29 = vld [vmem:[%s3992_s2 + $0x78] sm:$0xff]  }
   0xf   :  { %2770 = vmatprep.subr.bf16.mxu1 %v3013_v9  ;;  %v3029_v25 = vld [vmem:[%s3992_s2 + $0xf0] sm:$0xff]   ;;  %v3033_v30 = vld [vmem:[%s3992_s2 + $0xf8] sm:$0xff]   ;;  %v49_v34 = vld [vmem:[%s4011_s0] sm:$0xff] }
  0x10   :  { %v3030_v26 = vld [vmem:[%s3992_s2 + $0x30] sm:$0xff]   ;;  %v3034_v31 = vld [vmem:[%s3992_s2 + $0x38] sm:$0xff]   ;;  %v3037_v35 = vld [vmem:[%s3992_s2 + $0x140] sm:$0xff]   ;;  %v53_v40 = vcombine.high %v49_v34, %v49_v34  ;;  %v3431_v42 = vrot.slane %v49_v34, %v3428_v41 }
  0x11   :  { %2749 = vmatpush3.bf16.msra.mxu0 %v3014_v10  ;;  %v3031_v27 = vld [vmem:[%s3992_s2 + $0xb0] sm:$0xff]   ;;  %v3035_v32 = vld [vmem:[%s3992_s2 + $0xb8] sm:$0xff]   ;;  %v3038_v38 = vld [vmem:[%s3992_s2 + $0x1c0] sm:$0xff]  }
  0x12   :  { %2771 = vmatpush3.bf16.msra.mxu1 %v3015_v11  ;;  %2750 = vmatprep.subr.bf16.mxu0 %v3016_v12  ;;  %v3434_v43 = vrot.slane %v53_v40, %v3428_v41  ;;  %v3438_v44 = vcombine.high %v3431_v42, %v3431_v42  ;;  %v3039_v46 = vld [vmem:[%s3992_s2 + $0x100] sm:$0xff]   ;;  %v95_v47 = vpack.c.bf16 %v3431_v42, %v3431_v42  ;;  %v3041_v52 = vld [vmem:[%s3992_s2 + $0x148] sm:$0xff]   ;;  %v3045_v56 = vld [vmem:[%s3992_s2 + $0x150] sm:$0xff]  }
  0x13   :  { %2772 = vmatprep.subr.bf16.mxu1 %v3017_v13  ;;  %v3040_v49 = vld [vmem:[%s3992_s2 + $0x180] sm:$0xff]   ;;  %v3042_v53 = vld [vmem:[%s3992_s2 + $0x1c8] sm:$0xff]   ;;  %v3046_v57 = vld [vmem:[%s3992_s2 + $0x1d0] sm:$0xff]  }
  0x14   :  { %v3442_v45 = vcombine.high %v3434_v43, %v3434_v43  ;;  %v97_v48 = vpack.c.bf16 %v3434_v43, %v3434_v43  ;;  %v96_v50 = vpack.c.bf16 %v3438_v44, %v3438_v44  ;;  %v3043_v54 = vld [vmem:[%s3992_s2 + $0x108] sm:$0xff]   ;;  %v3047_v58 = vld [vmem:[%s3992_s2 + $0x110] sm:$0xff]   ;;  %v3049_v60 = vld [vmem:[%s3992_s2 + $0x158] sm:$0xff]  }
  0x15   :  { %2751 = vmatpush3.bf16.msra.mxu0 %v3018_v14  ;;  %v3044_v55 = vld [vmem:[%s3992_s2 + $0x188] sm:$0xff]   ;;  %v3048_v59 = vld [vmem:[%s3992_s2 + $0x190] sm:$0xff]   ;;  %v3050_v61 = vld [vmem:[%s3992_s2 + $0x1d8] sm:$0xff]  }
  0x16   :  { %2773 = vmatpush3.bf16.msra.mxu1 %v3019_v15  ;;  %2752 = vmatprep.subr.bf16.mxu0 %v3020_v16  ;;  %v98_v51 = vpack.c.bf16 %v3442_v45, %v3442_v45  ;;  %v3051_v62 = vld [vmem:[%s3992_s2 + $0x118] sm:$0xff]   ;;  %v3053_v0 = vld [vmem:[%s3992_s2 + $0x160] sm:$0xff]   ;;  %v3057_v4 = vld [vmem:[%s3992_s2 + $0x168] sm:$0xff]  }
  0x17   :  { %2774 = vmatprep.subr.bf16.mxu1 %v3021_v17  ;;  %654 = vmatprep.mubr.bf16.mxu0 %v96_v50  ;;  %v3052_v63 = vld [vmem:[%s3992_s2 + $0x198] sm:$0xff]   ;;  %v3054_v1 = vld [vmem:[%s3992_s2 + $0x1e0] sm:$0xff]   ;;  %v3058_v5 = vld [vmem:[%s3992_s2 + $0x1e8] sm:$0xff]  }
  0x18   :  { %694 = vmatprep.mubr.bf16.mxu1 %v98_v51  ;;  %v3055_v2 = vld [vmem:[%s3992_s2 + $0x120] sm:$0xff]   ;;  %v3059_v6 = vld [vmem:[%s3992_s2 + $0x128] sm:$0xff]   ;;  %v3061_v8 = vld [vmem:[%s3992_s2 + $0x170] sm:$0xff]  }
  0x19   :  { %2753 = vmatpush3.bf16.msra.mxu0 %v3022_v18  ;;  %v3056_v3 = vld [vmem:[%s3992_s2 + $0x1a0] sm:$0xff]   ;;  %v3060_v7 = vld [vmem:[%s3992_s2 + $0x1a8] sm:$0xff]   ;;  %v3062_v9 = vld [vmem:[%s3992_s2 + $0x1f0] sm:$0xff]  }
  0x1a   :  { %2775 = vmatpush3.bf16.msra.mxu1 %v3023_v19  ;;  %2754 = vmatprep.subr.bf16.mxu0 %v3024_v20  ;;  %v50_v10 = vld [vmem:[%s4011_s0 + $0x8] sm:$0xff] }
  0x1b   :  { %2776 = vmatprep.subr.bf16.mxu1 %v3025_v21 }
  0x1d   :  { %2755 = vmatpush3.bf16.msra.mxu0 %v3026_v22 }
  0x1e   :  { %2777 = vmatpush3.bf16.msra.mxu1 %v3027_v23  ;;  %2756 = vmatprep.subr.bf16.mxu0 %v3028_v24 }
  0x1f   :  { %2778 = vmatprep.subr.bf16.mxu1 %v3029_v25 }
  0x21   :  { %2757 = vmatpush3.bf16.msra.mxu0 %v3030_v26 }
  0x22   :  { %2779 = vmatpush3.bf16.msra.mxu1 %v3031_v27  ;;  %2758 = vmatprep.subr.bf16.mxu0 %v3032_v29 }
  0x23   :  { %2780 = vmatprep.subr.bf16.mxu1 %v3033_v30 }
  0x25   :  { %2759 = vmatpush3.bf16.msra.mxu0 %v3034_v31 }
  0x26   :  { %2781 = vmatpush3.bf16.msra.mxu1 %v3035_v32  ;;  %2788 = vmatprep.subr.bf16.mxu0 %v3037_v35 }
  0x27   :  { %2810 = vmatprep.subr.bf16.mxu1 %v3038_v38 }
  0x28   :  { %655 = vmatmul.mubr.bf16.vlgmr.msra.gmra.mrb[0].mxu0 %v95_v47 }
  0x29   :  { %695 = vmatmul.mubr.bf16.vlgmr.msra.gmra.mrb[0].mxu1 %v97_v48  ;;  %2789 = vmatpush3.bf16.msra.mxu0 %v3039_v46 }
  0x2a   :  { %2811 = vmatpush3.bf16.msra.mxu1 %v3040_v49  ;;  %2790 = vmatprep.subr.bf16.mxu0 %v3041_v52 }
  0x2b   :  { %2812 = vmatprep.subr.bf16.mxu1 %v3042_v53 }
  0x2d   :  { %2791 = vmatpush3.bf16.msra.mxu0 %v3043_v54 }
  0x2e   :  { %2813 = vmatpush3.bf16.msra.mxu1 %v3044_v55  ;;  %2792 = vmatprep.subr.bf16.mxu0 %v3045_v56 }
  0x2f   :  { %2814 = vmatprep.subr.bf16.mxu1 %v3046_v57 }
  0x31   :  { %2793 = vmatpush3.bf16.msra.mxu0 %v3047_v58 }
  0x32   :  { %2815 = vmatpush3.bf16.msra.mxu1 %v3048_v59  ;;  %2794 = vmatprep.subr.bf16.mxu0 %v3049_v60 }
  0x33   :  { %2816 = vmatprep.subr.bf16.mxu1 %v3050_v61 }
  0x35   :  { %2795 = vmatpush3.bf16.msra.mxu0 %v3051_v62 }
  0x36   :  { %2817 = vmatpush3.bf16.msra.mxu1 %v3052_v63  ;;  %2796 = vmatprep.subr.bf16.mxu0 %v3053_v0 }
  0x37   :  { %2818 = vmatprep.subr.bf16.mxu1 %v3054_v1 }
  0x39   :  { %2797 = vmatpush3.bf16.msra.mxu0 %v3055_v2 }
  0x3a   :  { %2819 = vmatpush3.bf16.msra.mxu1 %v3056_v3  ;;  %2798 = vmatprep.subr.bf16.mxu0 %v3057_v4 }
  0x3b   :  { %2820 = vmatprep.subr.bf16.mxu1 %v3058_v5 }
  0x3c   :  { %27 = vsyncpa [#allocation12], 0  ;;  %v3528_v11 = vrot.slane %v50_v10, %v3428_v41  ;;  %v70_v12 = vcombine.high %v50_v10, %v50_v10  ;;  %v3063_v13 = vld [vmem:[%s3992_s2 + $0x130] sm:$0xff]   ;;  %v3065_v17 = vld [vmem:[%s3992_s2 + $0x178] sm:$0xff]   ;;  %v3203_v30 = vmov 0.0|0.0   ;;  %vm3204_vm0 = vmmov 0  }
  0x3d   :  { %2799 = vmatpush3.bf16.msra.mxu0 %v3059_v6  ;;  %v3064_v14 = vld [vmem:[%s3992_s2 + $0x1b0] sm:$0xff]   ;;  %v3066_v18 = vld [vmem:[%s3992_s2 + $0x1f8] sm:$0xff]   ;;  %v782_v26 = vld [vmem:[%s3994_s4] sm:$0xff]  ;;  %v3205_v35 = vmov 0.0   ;;  %s4012_s1 = sld [smem:[#allocation20_spill]]  ;;  %s3206_s20 = smov 8  }
  0x3e   :  { %2821 = vmatpush3.bf16.msra.mxu1 %v3060_v7  ;;  %v3538_v15 = vcombine.high %v3528_v11, %v3528_v11  ;;  %v3541_v16 = vrot.slane %v70_v12, %v3428_v41  ;;  %2800 = vmatprep.subr.bf16.mxu0 %v3061_v8  ;;  %v3067_v21 = vld [vmem:[%s3992_s2 + $0x138] sm:$0xff]   ;;  %v99_v24 = vpack.c.bf16 %v3528_v11, %v3528_v11  ;;  %v783_v27 = vld [vmem:[%s3994_s4 + $0x8] sm:$0xff]  ;;  %v784_v31 = vld [vmem:[%s3994_s4 + $0x10] sm:$0xff]  ;;  %vm793_vm1 = vcmask 261120   ;;  %s3209_s25 = smov 88   ;;  %s3210_s26 = smov 112  }
  0x3f   :  { %2822 = vmatprep.subr.bf16.mxu1 %v3062_v9  ;;  %v3068_v22 = vld [vmem:[%s3992_s2 + $0x1b8] sm:$0xff]   ;;  %v2954_v29 = vpack.c.bf16 %v783_v27, %v782_v26  ;;  %v2628_v39 = vld [vmem:[%s3993_s3] ss:$0 sm:$0xff]  ;;  %vm881_vm2 = vcmask 254976   ;;  %vm883_vm3 = vcmask 58368   ;;  %vm892_vm4 = vcmask 64512  }
  0x40   :  { %v100_v19 = vpack.c.bf16 %v3538_v15, %v3538_v15  ;;  %v3553_v20 = vcombine.high %v3541_v16, %v3541_v16  ;;  %v101_v25 = vpack.c.bf16 %v3541_v16, %v3541_v16  ;;  %v785_v32 = vld [vmem:[%s3994_s4 + $0x18] sm:$0xff]  ;;  %v2693_v3 = vld [vmem:[%s3995_s5] ss:$0 sm:$0xff]  ;;  %s3207_s5 = smov 120   ;;  %s3211_s2 = smov 72   ;;  %vm1892_vm6 = vcmask 130048  }
  0x41   :  { %2801 = vmatpush3.bf16.msra.mxu0 %v3063_v13  ;;  %v2957_v34 = vpack.c.bf16 %v785_v32, %v784_v31  ;;  %v891_v9 = vld [vmem:[%s3996_s6] sm:$0xff]  ;;  %s3208_s6 = smov 104   ;;  %s3212_s27 = smov 96   ;;  %vm1894_vm7 = vcmask 195584   ;;  %vm1897_vm8 = vcmask 326656   ;;  %vm1899_vm9 = vcmask 392192  }
  0x42   :  { %2823 = vmatpush3.bf16.msra.mxu1 %v3064_v14  ;;  %v102_v23 = vpack.c.bf16 %v3553_v20, %v3553_v20  ;;  %2802 = vmatprep.subr.bf16.mxu0 %v3065_v17  ;;  %s3213_s28 = smov 80   ;;  %s3216_s19 = smov 32   ;;  %vm1901_vm10 = vcmask 457728   ;;  %vm1911_vm11 = vcmask 523264   ;;  %vm2449_vm12 = vcmask 1041408  }
  0x43   :  { %2824 = vmatprep.subr.bf16.mxu1 %v3066_v18  ;;  %734 = vmatprep.mubr.bf16.mxu0 %v100_v19  ;;  %v870_v36 = vld [vmem:[%s4012_s1] sm:$0x3]  ;;  %s3218_s1 = smov 24   ;;  %s3219_s4 = smov 48   ;;  %vm2495_vm13 = vcmask 1024  }
  0x44   :  { %774 = vmatprep.mubr.bf16.mxu1 %v102_v23  ;;  %872 = vrot.lane.b32.xlu0 %v870_v36, %s3206_s20  ;;  %s3220_s21 = smov 40   ;;  %s3221_s3 = smov 56  }
  0x45   :  { %2803 = vmatpush3.bf16.msra.mxu0 %v3067_v21 }
  0x46   :  { %2825 = vmatpush3.bf16.msra.mxu1 %v3068_v22  ;;  %2894 = vmatprep.subr.mxu0 %v3205_v35 }
  0x47   :  { %2953 = vmatprep.subr.bf16.mxu1 %v3203_v30 }
  0x48   :  { %735 = vmatmul.mubr.bf16.vlgmr.msra.gmra.mrb[4].mxu0 %v99_v24 }
  0x49   :  { %775 = vmatmul.mubr.bf16.vlgmr.msra.gmra.mrb[4].mxu1 %v101_v25  ;;  %2896 = vmatprep.mubr.msk.f32.mxu0 %vm3204_vm0, %v3205_v35  ;;  %v3214_v25 = vmov 1934713408  }
  0x4a   :  { %2955 = vmatpush3.bf16.msra.mxu1 %v2954_v29  ;;  %2876 = vmatprep.mubr.msk.f32.mxu1 %vm3204_vm0, %v3205_v35  ;;  %v1022_v26 = vunpack.c.l.s4 %v3214_v25 }
  0x4b   :  { %2956 = vmatprep.subr.bf16.mxu1 %v3203_v30 }
  0x4e   :  { %2958 = vmatpush3.bf16.msra.mxu1 %v2957_v34  ;;  %v1023_v34 = vunpack.c.0.s8 %v1022_v26 }
  0x4f   :  { %2879 = vmatprep.subr.mxu1 %v3205_v35 }
  0xb6   :  { %v873_v10 = vpop.permute.xlu0 %872 }
  0xfb   :  { %v2760_v37 = vpop.f32.mrb[0].mxu0 }
  0xfc   :  { %v2782_v38 = vpop.f32.mrb[0].mxu1  ;;  %v2761_v40 = vpop.f32.mrb[1].mxu0 }
  0xfd   :  { %v2783_v46 = vpop.f32.mrb[1].mxu1  ;;  %v2762_v47 = vadd.f32 %v2761_v40, %v2760_v37  ;;  %v2763_v49 = vpop.f32.mrb[2].mxu0 }
  0xfe   :  { %v2784_v48 = vadd.f32 %v2783_v46, %v2782_v38  ;;  %v2785_v50 = vpop.f32.mrb[2].mxu1  ;;  %v2764_v51 = vpop.f32.mrb[3].mxu0  ;;  %v3624_v46 = vsub.s32 %v1023_v34, %v3416_v33 }
  0xff   :  { %v2786_v52 = vpop.f32.mrb[3].mxu1  ;;  %v657_v53 = vadd.f32 %v2762_v47, %v2628_v39 }
 0x101   :  { %v697_v54 = vadd.f32 %v2784_v48, %v657_v53 }
 0x11b   :  { %v2804_v55 = vpop.f32.mrb[4].mxu0 }
 0x11c   :  { %v2826_v56 = vpop.f32.mrb[4].mxu1  ;;  %v2805_v57 = vpop.f32.mrb[5].mxu0 }
 0x11d   :  { %v2827_v58 = vpop.f32.mrb[5].mxu1  ;;  %v2806_v59 = vadd.f32 %v2805_v57, %v2804_v55  ;;  %v2807_v61 = vpop.f32.mrb[6].mxu0  ;;  %v1041_v55 = vand.u32 127, %v57_v28 }
 0x11e   :  { %v2828_v60 = vadd.f32 %v2827_v58, %v2826_v56  ;;  %v2829_v62 = vpop.f32.mrb[6].mxu1  ;;  %v2808_v63 = vpop.f32.mrb[7].mxu0 }
 0x11f   :  { %v2830_v0 = vpop.f32.mrb[7].mxu1  ;;  %v737_v1 = vadd.f32 %v2806_v59, %v697_v54  ;;  %vm1042_vm5 = vcmp.eq.s32.totalorder %v3416_v33, %v1041_v55 }
 0x120   :  { %v2696_v56 = vsel %vm1042_vm5, 1.0, %v3205_v35 }
 0x121   :  { %v3594_v2 = vadd.f32 %v2828_v60, %v737_v1 }
 0x123   :  { %2877 = vmatmul.mubr.msk.f32.vlgmr.msra.gmra.mrb[8].mxu1 %vm793_vm1, %v3594_v2  ;;  %882 = vst.msk [vmem:[#allocation2] sm:$0x3] %vm881_vm2, %v3594_v2 }
 0x124   :  { %2881 = vmatprep.mubr.msk.f32.mxu1 %vm3204_vm0, %v3205_v35  ;;  %2880 = vmatpush3.msra.mxu1 %v891_v9 }
 0x125   :  { %2884 = vmatprep.subr.mxu1 %v3205_v35 }
 0x1f6   :  { %v863_v4 = vpop.f32.mrb[8].mxu1 }
 0x1f7   :  { %v3605_v5 = vadd.f32 %v2693_v3, %v863_v4  ;;  %v2878_v6 = vpop.f32.mrb[9].mxu1 }
 0x1f9   :  { %v867_v7 = vmul.f32 0.5, %v3605_v5  ;;  %884 = vst.msk [vmem:[#allocation5] sm:$0x3] %vm883_vm3, %v3605_v5 }
 0x1fb   :  { %v868_v8 = vmul.f32 1.442695, %v867_v7 }
 0x1fd   :  { %3070 = vpow2.f32 %v868_v8 }
 0x207   :  { %v3071_v12 = vpop.eup %3070 }
 0x208   :  { %v875_v13 = vmul.f32 %v3071_v12, %v873_v10 }
 0x20a   :  { %877 = vrot.lane.b32.xlu0 %v875_v13, %s3207_s5 }
 0x27c   :  { %v878_v14 = vpop.permute.xlu0 %877 }
 0x27d   :  { %v880_v17 = vadd.f32 %v878_v14, %v3605_v5 }
 0x27f   :  { %2882 = vmatmul.mubr.msk.f32.vlgmr.msra.gmra.mrb[10].mxu1 %vm892_vm4, %v880_v17  ;;  %890 = vst.msk [vmem:[#allocation8] sm:$0x3] %vm883_vm3, %v880_v17 }
 0x280   :  { %2886 = vmatprep.mubr.msk.f32.mxu1 %vm3204_vm0, %v3205_v35 }
 0x352   :  { %v962_v18 = vpop.f32.mrb[10].mxu1 }
 0x353   :  { %973 = vrot.lane.b32.xlu0 %v962_v18, %s3208_s6  ;;  %967 = vrot.lane.b32.xlu1 %v962_v18, %s3207_s5  ;;  %v2883_v19 = vpop.f32.mrb[11].mxu1 }
 0x357   :  { %979 = vrot.lane.b32.xlu0 %v962_v18, %s3209_s25  ;;  %970 = vrot.lane.b32.xlu1 %v962_v18, %s3210_s26 }
 0x35b   :  { %985 = vrot.lane.b32.xlu0 %v962_v18, %s3211_s2  ;;  %976 = vrot.lane.b32.xlu1 %v962_v18, %s3212_s27 }
 0x35f   :  { %982 = vrot.lane.b32.xlu1 %v962_v18, %s3213_s28  ;;  %s3215_s28 = smov 16  }
 0x3c5   :  { %v974_v21 = vpop.permute.xlu0 %973  ;;  %v968_v22 = vpop.permute.xlu1 %967 }
 0x3c6   :  { %v996_v32 = vcombine.low %v968_v22, %v974_v21 }
 0x3c8   :  { %v1003_v39 = vrot.slane %v996_v32, %v3428_v41 }
 0x3c9   :  { %v980_v23 = vpop.permute.xlu0 %979  ;;  %v971_v24 = vpop.permute.xlu1 %970 }
 0x3ca   :  { %v988_v27 = vcombine.low %v962_v18, %v971_v24 }
 0x3cc   :  { %v995_v36 = vrot.slane %v988_v27, %v3428_v41 }
 0x3cd   :  { %v986_v29 = vpop.permute.xlu0 %985  ;;  %v977_v31 = vpop.permute.xlu1 %976 }
 0x3ce   :  { %v1012_v37 = vcombine.low %v980_v23, %v986_v29  ;;  %v1020_v47 = vcombine.low %v995_v36, %v1003_v39 }
 0x3d0   :  { %v1019_v48 = vrot.slane %v1012_v37, %v3428_v41  ;;  %v1027_v51 = vrot.slane %v1020_v47, %v3624_v46  ;;  %v1904_v47 = vld [vmem:[%s3997_s7 + $0x8] sm:$0xff] }
 0x3d1   :  { %v983_v38 = vpop.permute.xlu1 %982 }
 0x3d2   :  { %v1004_v40 = vcombine.low %v977_v31, %v983_v38 }
 0x3d4   :  { %v1011_v49 = vrot.slane %v1004_v40, %v3428_v41  ;;  %v1903_v40 = vld [vmem:[%s3997_s7] sm:$0xff] }
 0x3d6   :  { %v1028_v50 = vcombine.low %v1011_v49, %v1019_v48  ;;  %v2960_v48 = vpack.c.bf16 %v1904_v47, %v1903_v40  ;;  %v1986_v49 = vld [vmem:[%s3998_s8] sm:$0xff]  ;;  %v3752_v40 = vld [vmem:[%s3998_s8 + $0x30] sm:$0xff] }
 0x3d8   :  { %v1035_v52 = vrot.slane %v1028_v50, %v3624_v46  ;;  %v1990_v50 = vld [vmem:[%s3998_s8 + $0x20] sm:$0xff] }
 0x3da   :  { %v1036_v53 = vcombine.low %v1027_v51, %v1035_v52  ;;  %v1037_v54 = vcombine.high %v1027_v51, %v1035_v52  ;;  %v2708_v51 = vcombine.low %v1986_v49, %v1990_v50  ;;  %v2709_v52 = vcombine.high %v1986_v49, %v1990_v50 }
 0x3dc   :  { %2885 = vmatpush3.msra.mxu1 %v1036_v53  ;;  %2895 = vmatpush3.msra.mxu0 %v1036_v53  ;;  %v1347_v59 = vmul.f32 0.041666668, %v1036_v53  ;;  %v1337_v62 = vadd.f32 %v2696_v56, %v1036_v53  ;;  %v1348_v28 = vmul.f32 0.041666668, %v1037_v54  ;;  %v1338_v7 = vadd.f32 %v2696_v56, %v1037_v54 }
 0x3dd   :  { %2887 = vmatmul.mubr.msk.f32.vlgmr.msra.gmra.mrb[12].mxu1 %vm892_vm4, %v1036_v53  ;;  %2889 = vmatprep.subr.mxu1 %v3205_v35  ;;  %v1905_v53 = vld [vmem:[%s3997_s7 + $0x10] sm:$0xff] }
 0x3de   :  { %2890 = vmatpush3.msra.mxu1 %v1037_v54  ;;  %2891 = vmatprep.mubr.msk.f32.mxu1 %vm3204_vm0, %v3205_v35 }
 0x3df   :  { %2899 = vmatprep.subr.mxu1 %v3205_v35  ;;  %2904 = vmatprep.subr.mxu0 %v3205_v35 }
 0x3e1   :  { %2892 = vmatmul.mubr.msk.f32.vlgmr.msra.gmra.mrb[14].mxu1 %vm892_vm4, %v1037_v54 }
 0x3e2   :  { %2900 = vmatpush3.msra.mxu1 %v1037_v54  ;;  %2901 = vmatprep.mubr.msk.f32.mxu1 %vm3204_vm0, %v3205_v35  ;;  %v1906_v54 = vld [vmem:[%s3997_s7 + $0x18] sm:$0xff] }
 0x3e3   :  { %2909 = vmatprep.subr.mxu1 %v3205_v35  ;;  %v2963_v56 = vpack.c.bf16 %v1906_v54, %v1905_v53  ;;  %v2478_v54 = vmul.f32 %v3605_v5, %v3605_v5 }
 0x4b0   :  { %v1114_v57 = vpop.f32.mrb[12].mxu1 }
 0x4b1   :  { %v1339_v58 = vmul.f32 0.5, %v1114_v57  ;;  %v1349_v60 = vmul.f32 0.008333334, %v1114_v57  ;;  %v2888_v61 = vpop.f32.mrb[13].mxu1  ;;  %2897 = vmatmul.mubr.msk.f32.vlgmr.msra.gmra.mrb[8].mxu0 %vm892_vm4, %v1114_v57  ;;  %v1994_v57 = vld [vmem:[%s3998_s8 + $0x40] sm:$0xff] }
 0x4b2   :  { %2906 = vmatprep.mubr.msk.f32.mxu0 %vm3204_vm0, %v3205_v35 }
 0x4b3   :  { %v1351_v63 = vadd.f32 %v1349_v60, %v1347_v59  ;;  %v1341_v0 = vadd.f32 %v1339_v58, %v1337_v62  ;;  %v1998_v58 = vld [vmem:[%s3998_s8 + $0x60] sm:$0xff] }
 0x4b4   :  { %v1187_v1 = vpop.f32.mrb[14].mxu1  ;;  %v2716_v60 = vcombine.low %v1994_v57, %v1998_v58  ;;  %v2717_v61 = vcombine.high %v1994_v57, %v1998_v58  ;;  %v2484_v57 = vmul.f32 1.442695, %v3605_v5 }
 0x4b5   :  { %v1340_v3 = vmul.f32 0.5, %v1187_v1  ;;  %v1350_v4 = vmul.f32 0.008333334, %v1187_v1  ;;  %v2893_v6 = vpop.f32.mrb[15].mxu1  ;;  %2902 = vmatmul.mubr.msk.f32.vlgmr.msra.gmra.mrb[16].mxu1 %vm892_vm4, %v1187_v1 }
 0x4b6   :  { %2911 = vmatprep.mubr.msk.f32.mxu1 %vm3204_vm0, %v3205_v35  ;;  %v2006_v6 = vld [vmem:[%s3998_s8 + $0xa0] sm:$0xff]  ;;  %3072 = vpow2.f32 %v2484_v57  ;;  %v2005_v57 = vld [vmem:[%s3998_s8 + $0x98] sm:$0xff] }
 0x4b7   :  { %v1352_v8 = vadd.f32 %v1350_v4, %v1348_v28  ;;  %v1342_v9 = vadd.f32 %v1340_v3, %v1338_v7  ;;  %v2002_v4 = vld [vmem:[%s3998_s8 + $0x80] sm:$0xff] }
 0x584   :  { %v1260_v10 = vpop.f32.mrb[8].mxu0 }
 0x585   :  { %v1343_v12 = vmul.f32 0.16666667, %v1260_v10  ;;  %v1353_v13 = vmul.f32 0.0013888889, %v1260_v10  ;;  %v2898_v14 = vpop.f32.mrb[9].mxu0 }
 0x587   :  { %v1355_v17 = vadd.f32 %v1353_v13, %v1351_v63  ;;  %v1345_v18 = vadd.f32 %v1343_v12, %v1341_v0  ;;  %v1907_v63 = vld [vmem:[%s3997_s7 + $0x20] sm:$0xff]  ;;  %v1908_v0 = vld [vmem:[%s3997_s7 + $0x28] sm:$0xff]  ;;  %v2725_v12 = vcombine.high %v2002_v4, %v2006_v6 }
 0x588   :  { %v1333_v19 = vpop.f32.mrb[16].mxu1  ;;  %v2966_v28 = vpack.c.bf16 %v1908_v0, %v1907_v63 }
 0x589   :  { %v1344_v21 = vmul.f32 0.16666667, %v1333_v19  ;;  %v1354_v22 = vmul.f32 0.0013888889, %v1333_v19  ;;  %v2903_v23 = vpop.f32.mrb[17].mxu1  ;;  %2905 = vmatpush3.msra.mxu0 %v1355_v17 }
 0x58a   :  { %2907 = vmatmul.mubr.msk.f32.vlgmr.msra.gmra.mrb[10].mxu0 %vm892_vm4, %v1260_v10  ;;  %2914 = vmatprep.subr.mxu0 %v3205_v35  ;;  %v2724_v10 = vcombine.low %v2002_v4, %v2006_v6  ;;  %v2010_v23 = vld [vmem:[%s3998_s8 + $0xc0] sm:$0xff]  ;;  %v1999_v4 = vld [vmem:[%s3998_s8 + $0x68] sm:$0xff] }
 0x58b   :  { %v1356_v24 = vadd.f32 %v1354_v22, %v1352_v8  ;;  %2916 = vmatprep.mubr.msk.f32.mxu0 %vm3204_vm0, %v3205_v35  ;;  %v1346_v25 = vadd.f32 %v1344_v21, %v1342_v9  ;;  %v1910_v21 = vld [vmem:[%s3997_s7 + $0x38] sm:$0xff] }
 0x58d   :  { %2910 = vmatpush3.msra.mxu1 %v1356_v24  ;;  %v2014_v24 = vld [vmem:[%s3998_s8 + $0xe0] sm:$0xff] }
 0x58e   :  { %2912 = vmatmul.mubr.msk.f32.vlgmr.msra.gmra.mrb[18].mxu1 %vm892_vm4, %v1333_v19  ;;  %2919 = vmatprep.subr.mxu1 %v3205_v35  ;;  %v1909_v19 = vld [vmem:[%s3997_s7 + $0x30] sm:$0xff] }
 0x58f   :  { %2921 = vmatprep.mubr.msk.f32.mxu1 %vm3204_vm0, %v3205_v35  ;;  %v2969_v22 = vpack.c.bf16 %v1910_v21, %v1909_v19  ;;  %v2003_v19 = vld [vmem:[%s3998_s8 + $0x88] sm:$0xff] }
 0x590   :  { %v2007_v21 = vld [vmem:[%s3998_s8 + $0xa8] sm:$0xff] }
 0x65d   :  { %v1426_v26 = vpop.f32.mrb[10].mxu0 }
 0x65e   :  { %v1503_v27 = vadd.f32 %v1426_v26, %v1345_v18  ;;  %v2908_v29 = vpop.f32.mrb[11].mxu0 }
 0x65f   :  { %v2732_v29 = vcombine.low %v2010_v23, %v2014_v24 }
 0x660   :  { %2915 = vmatpush3.msra.mxu0 %v1503_v27 }
 0x661   :  { %v1499_v31 = vpop.f32.mrb[18].mxu1  ;;  %2917 = vmatmul.mubr.msk.f32.vlgmr.msra.gmra.mrb[12].mxu0 %vm892_vm4, %v1503_v27  ;;  %2924 = vmatprep.subr.mxu0 %v3205_v35 }
 0x662   :  { %v1504_v32 = vadd.f32 %v1499_v31, %v1346_v25  ;;  %v2913_v34 = vpop.f32.mrb[19].mxu1  ;;  %2926 = vmatprep.mubr.msk.f32.mxu0 %vm3204_vm0, %v3205_v35  ;;  %v2733_v31 = vcombine.high %v2010_v23, %v2014_v24 }
 0x663   :  { %v3737_v34 = vld [vmem:[%s3998_s8 + $0x28] sm:$0xff] }
 0x664   :  { %2920 = vmatpush3.msra.mxu1 %v1504_v32 }
 0x665   :  { %2922 = vmatmul.mubr.msk.f32.vlgmr.msra.gmra.mrb[20].mxu1 %vm892_vm4, %v1504_v32  ;;  %2929 = vmatprep.subr.mxu1 %v3205_v35  ;;  %v3732_v32 = vld [vmem:[%s3998_s8 + $0x8] sm:$0xff] }
 0x666   :  { %2931 = vmatprep.mubr.msk.f32.mxu1 %vm3204_vm0, %v3205_v35 }
 0x734   :  { %v1574_v36 = vpop.f32.mrb[12].mxu0 }
 0x735   :  { %v2918_v37 = vpop.f32.mrb[13].mxu0  ;;  %2925 = vmatpush3.msra.mxu0 %v1574_v36 }
 0x736   :  { %2927 = vmatmul.mubr.msk.f32.vlgmr.msra.gmra.mrb[14].mxu0 %vm892_vm4, %v1574_v36  ;;  %2959 = vmatprep.subr.bf16.mxu0 %v3203_v30  ;;  %v2710_v37 = vcombine.low %v3732_v32, %v3737_v34 }
 0x737   :  { %2950 = vmatprep.mubr.msk.f32.mxu0 %vm3204_vm0, %v3205_v35  ;;  %2961 = vmatpush3.bf16.msra.mxu0 %v2960_v48 }
 0x738   :  { %v1647_v38 = vpop.f32.mrb[20].mxu1  ;;  %2962 = vmatprep.subr.bf16.mxu0 %v3203_v30 }
 0x739   :  { %v2923_v39 = vpop.f32.mrb[21].mxu1  ;;  %2930 = vmatpush3.msra.mxu1 %v1647_v38 }
 0x73a   :  { %2932 = vmatmul.mubr.msk.f32.vlgmr.msra.gmra.mrb[22].mxu1 %vm892_vm4, %v1647_v38  ;;  %2223 = vmatprep.subr.bf16.mxu1 %v2709_v52  ;;  %v2711_v38 = vcombine.high %v3732_v32, %v3737_v34  ;;  %v3747_v39 = vld [vmem:[%s3998_s8 + $0x10] sm:$0xff]  ;;  %v2726_v34 = vcombine.low %v2003_v19, %v2007_v21 }
 0x73b   :  { %2224 = vmatpush1.bf16.msra.mxu1 %v2708_v51  ;;  %2964 = vmatpush3.bf16.msra.mxu0 %v2963_v56  ;;  %v2713_v48 = vcombine.high %v3747_v39, %v3752_v40  ;;  %v2712_v49 = vcombine.low %v3747_v39, %v3752_v40  ;;  %v3217_v51 = vmov 0   ;;  %v1989_v40 = vld [vmem:[%s3998_s8 + $0x18] sm:$0xff] }
 0x73c   :  { %2225 = vmatprep.subr.bf16.mxu1 %v2717_v61  ;;  %2965 = vmatprep.subr.bf16.mxu0 %v3203_v30 }
 0x73d   :  { %2255 = vmatprep.mubr.bf16.mxu1 %v3217_v51 }
 0x73f   :  { %2226 = vmatpush1.bf16.msra.mxu1 %v2716_v60  ;;  %2967 = vmatpush3.bf16.msra.mxu0 %v2966_v28  ;;  %v1995_v28 = vld [vmem:[%s3998_s8 + $0x48] sm:$0xff] }
 0x740   :  { %2227 = vmatprep.subr.bf16.mxu1 %v2725_v12  ;;  %2968 = vmatprep.subr.bf16.mxu0 %v3203_v30  ;;  %v2718_v24 = vcombine.low %v1995_v28, %v1999_v4 }
 0x743   :  { %2228 = vmatpush1.bf16.msra.mxu1 %v2724_v10  ;;  %2970 = vmatpush3.bf16.msra.mxu0 %v2969_v22  ;;  %v3073_v10 = vpop.eup %3072 }
 0x744   :  { %2229 = vmatprep.subr.bf16.mxu1 %v2733_v31  ;;  %2264 = vmatprep.subr.bf16.mxu0 %v2711_v38  ;;  %v2015_v31 = vld [vmem:[%s3998_s8 + $0xe8] sm:$0xff] }
 0x747   :  { %2230 = vmatpush1.bf16.msra.mxu1 %v2732_v29  ;;  %v2011_v29 = vld [vmem:[%s3998_s8 + $0xc8] sm:$0xff] }
 0x748   :  { %2305 = vmatprep.subr.bf16.mxu1 %v2713_v48  ;;  %v2735_v38 = vcombine.high %v2011_v29, %v2015_v31 }
 0x809   :  { %v1720_v55 = vpop.f32.mrb[14].mxu0 }
 0x80a   :  { %v2928_v59 = vpop.f32.mrb[15].mxu0  ;;  %v1797_v62 = vcombine.high %v1720_v55, %v3205_v35  ;;  %v1804_v1 = vrot.slane %v1720_v55, %v3428_v41 }
 0x80c   :  { %v1811_v13 = vrot.slane %v1797_v62, %v3428_v41 }
 0x80d   :  { %v1793_v3 = vpop.f32.mrb[22].mxu1 }
 0x80e   :  { %v1812_v7 = vcombine.high %v1793_v3, %v3205_v35  ;;  %v1819_v8 = vrot.slane %v1793_v3, %v3428_v41  ;;  %v2933_v9 = vpop.f32.mrb[23].mxu1  ;;  %v2477_v3 = vadd.f32 1.0, %v3605_v5 }
 0x80f   :  { %v2000_v9 = vld [vmem:[%s3998_s8 + $0x70] sm:$0xff] }
 0x810   :  { %v1826_v14 = vrot.slane %v1812_v7, %v3428_v41  ;;  %v1827_v17 = vcombine.low %v1804_v1, %v1819_v8  ;;  %v1828_v18 = vcombine.high %v1804_v1, %v1819_v8  ;;  %v1996_v8 = vld [vmem:[%s3998_s8 + $0x50] sm:$0xff] }
 0x811   :  { %v2721_v23 = vcombine.high %v1996_v8, %v2000_v9 }
 0x812   :  { %v1835_v30 = vrot.slane %v1827_v17, %v3624_v46  ;;  %v1843_v25 = vcombine.low %v1811_v13, %v1826_v14  ;;  %v1844_v26 = vcombine.high %v1811_v13, %v1826_v14  ;;  %v1842_v27 = vrot.slane %v1828_v18, %v3624_v46 }
 0x813   :  { %v2719_v14 = vcombine.high %v1995_v28, %v1999_v4  ;;  %v2026_v28 = vsub.s32 1, %v3416_v33 }
 0x814   :  { %1868 = vrot.lane.b32.xlu0 %v1842_v27, %s3215_s28  ;;  %v1859_v36 = vcombine.high %v1835_v30, %v3205_v35  ;;  %v1851_v47 = vrot.slane %v1843_v25, %v3624_v46  ;;  %v1860_v50 = vcombine.high %v1842_v27, %v3205_v35  ;;  %v1858_v52 = vrot.slane %v1844_v26, %v3624_v46  ;;  %v2008_v25 = vld [vmem:[%s3998_s8 + $0xb0] sm:$0xff] }
 0x815   :  { %v2727_v26 = vcombine.high %v2003_v19, %v2007_v21  ;;  %v2720_v27 = vcombine.low %v1996_v8, %v2000_v9 }
 0x816   :  { %1864 = vrot.lane.b32.xlu1 %v1859_v36, %s3206_s20  ;;  %v1861_v53 = vcombine.high %v1851_v47, %v3205_v35  ;;  %v1862_v55 = vcombine.high %v1858_v52, %v3205_v35  ;;  %v2012_v36 = vld [vmem:[%s3998_s8 + $0xd0] sm:$0xff] }
 0x818   :  { %1876 = vrot.lane.b32.xlu0 %v1851_v47, %s3216_s19  ;;  %v1993_v47 = vld [vmem:[%s3998_s8 + $0x38] sm:$0xff] }
 0x81a   :  { %1872 = vrot.lane.b32.xlu1 %v1860_v50, %s3218_s1  ;;  %v2715_v50 = vcombine.high %v1989_v40, %v1993_v47 }
 0x81c   :  { %1884 = vrot.lane.b32.xlu0 %v1858_v52, %s3219_s4 }
 0x81e   :  { %1880 = vrot.lane.b32.xlu1 %v1861_v53, %s3220_s21  ;;  %v1997_v53 = vld [vmem:[%s3998_s8 + $0x58] sm:$0xff] }
 0x820   :  { %2480 = vrot.lane.b32.xlu0 %v2478_v54, %s3206_s20  ;;  %v2001_v54 = vld [vmem:[%s3998_s8 + $0x78] sm:$0xff] }
 0x822   :  { %1888 = vrot.lane.b32.xlu1 %v1862_v55, %s3221_s3  ;;  %v2714_v55 = vcombine.low %v1989_v40, %v1993_v47 }
 0x886   :  { %v1869_v56 = vpop.permute.xlu0 %1868 }
 0x888   :  { %v1865_v58 = vpop.permute.xlu1 %1864 }
 0x889   :  { %v1891_v46 = vsel %vm892_vm4, %v1835_v30, %v1865_v58  ;;  %v2004_v30 = vld [vmem:[%s3998_s8 + $0x90] sm:$0xff]  ;;  %v2009_v58 = vld [vmem:[%s3998_s8 + $0xb8] sm:$0xff] }
 0x88a   :  { %v1877_v59 = vpop.permute.xlu0 %1876  ;;  %v1893_v60 = vsel %vm1892_vm6, %v1891_v46, %v1869_v56  ;;  %v2729_v32 = vcombine.high %v2004_v30, %v2008_v25  ;;  %v2728_v39 = vcombine.low %v2004_v30, %v2008_v25  ;;  %v2723_v56 = vcombine.high %v1997_v53, %v2001_v54 }
 0x88b   :  { %v2722_v46 = vcombine.low %v1997_v53, %v2001_v54 }
 0x88c   :  { %v1873_v61 = vpop.permute.xlu1 %1872 }
 0x88d   :  { %v1895_v62 = vsel %vm1894_vm7, %v1893_v60, %v1873_v61  ;;  %v2013_v60 = vld [vmem:[%s3998_s8 + $0xd8] sm:$0xff] }
 0x88e   :  { %v1885_v63 = vpop.permute.xlu0 %1884  ;;  %v1896_v0 = vsel %vm793_vm1, %v1895_v62, %v1877_v59  ;;  %v2731_v59 = vcombine.high %v2005_v57, %v2009_v58  ;;  %v2017_v61 = vld [vmem:[%s3998_s8 + $0xf8] sm:$0xff]  ;;  %v2730_v62 = vcombine.low %v2005_v57, %v2009_v58 }
 0x890   :  { %v1881_v35 = vpop.permute.xlu1 %1880 }
 0x891   :  { %v1898_v1 = vsel %vm1897_vm8, %v1896_v0, %v1881_v35  ;;  %v2738_v0 = vcombine.low %v2013_v60, %v2017_v61 }
 0x892   :  { %v2481_v6 = vpop.permute.xlu0 %2480  ;;  %v1900_v12 = vsel %vm1899_vm9, %v1898_v1, %v1885_v63  ;;  %v2739_v63 = vcombine.high %v2013_v60, %v2017_v61  ;;  %v2022_v1 = vsub.s32 0, %v3416_v33 }
 0x893   :  { %v2483_v7 = vsub.f32 %v2477_v3, %v2481_v6  ;;  %v3858_v3 = vld [vmem:[%s3999_s9] sm:$0xff] }
 0x894   :  { %v1889_v13 = vpop.permute.xlu1 %1888  ;;  %v2023_v4 = vrot.slane %v3858_v3, %v2022_v1 }
 0x895   :  { %v2486_v17 = vsub.f32 %v2483_v7, %v3073_v10  ;;  %v1902_v18 = vsel %vm1901_vm10, %v1900_v12, %v1889_v13  ;;  %v2027_v7 = vrot.slane %v3858_v3, %v2026_v28 }
 0x896   :  { %v3790_v22 = vpack.c.bf16 %v1902_v18, %v1902_v18  ;;  %2951 = vmatmul.mubr.msk.f32.vlgmr.msra.gmra.mrb[16].mxu0 %vm1911_vm11, %v1902_v18 }
 0x897   :  { %2265 = vmatpush1.bf16.msra.mxu0 %v2710_v37  ;;  %2488 = vrot.lane.b32.xlu1 %v2486_v17, %s3207_s5  ;;  %v2016_v37 = vld [vmem:[%s3998_s8 + $0xf0] sm:$0xff] }
 0x898   :  { %2740 = vmatmul.mubr.msk.bf16.vlgmr.msra.gmra.mrb[24].mxu1 %vm1911_vm11, %v3790_v22  ;;  %2266 = vmatprep.subr.bf16.mxu0 %v2719_v14  ;;  %v2737_v48 = vcombine.high %v2012_v36, %v2016_v37  ;;  %v2736_v52 = vcombine.low %v2012_v36, %v2016_v37 }
 0x899   :  { %2306 = vmatpush1.bf16.msra.mxu1 %v2712_v49  ;;  %2296 = vmatprep.mubr.bf16.mxu0 %v3217_v51  ;;  %v2734_v49 = vcombine.low %v2011_v29, %v2015_v31  ;;  %v2034_v29 = vsub.s32 3, %v3416_v33 }
 0x89a   :  { %2307 = vmatprep.subr.bf16.mxu1 %v2721_v23  ;;  %2337 = vmatprep.mubr.bf16.mxu1 %v3217_v51 }
 0x89b   :  { %2267 = vmatpush1.bf16.msra.mxu0 %v2718_v24 }
 0x89c   :  { %2268 = vmatprep.subr.bf16.mxu0 %v2727_v26  ;;  %v2030_v26 = vsub.s32 2, %v3416_v33 }
 0x89d   :  { %2308 = vmatpush1.bf16.msra.mxu1 %v2720_v27 }
 0x89e   :  { %2309 = vmatprep.subr.bf16.mxu1 %v2729_v32  ;;  %v2042_v32 = vsub.s32 5, %v3416_v33 }
 0x89f   :  { %2269 = vmatpush1.bf16.msra.mxu0 %v2726_v34  ;;  %v2031_v34 = vrot.slane %v3858_v3, %v2030_v26 }
 0x8a0   :  { %2270 = vmatprep.subr.bf16.mxu0 %v2735_v38  ;;  %v2043_v38 = vrot.slane %v3858_v3, %v2042_v32 }
 0x8a1   :  { %2310 = vmatpush1.bf16.msra.mxu1 %v2728_v39 }
 0x8a2   :  { %2311 = vmatprep.subr.bf16.mxu1 %v2737_v48 }
 0x8a3   :  { %2271 = vmatpush1.bf16.msra.mxu0 %v2734_v49 }
 0x8a4   :  { %2346 = vmatprep.subr.bf16.mxu0 %v2715_v50 }
 0x8a5   :  { %2312 = vmatpush1.bf16.msra.mxu1 %v2736_v52 }
 0x8a6   :  { %2741 = vmatmul.mubr.msk.bf16.vlgmr.msra.gmra.mrb[20].mxu0 %vm1911_vm11, %v3790_v22 }
 0x8a7   :  { %2347 = vmatpush1.bf16.msra.mxu0 %v2714_v55  ;;  %2378 = vmatprep.mubr.bf16.mxu0 %v3217_v51 }
 0x8a8   :  { %2742 = vmatmul.mubr.msk.bf16.vlgmr.msra.gmra.mrb[28].mxu1 %vm1911_vm11, %v3790_v22  ;;  %2348 = vmatprep.subr.bf16.mxu0 %v2723_v56 }
 0x8ab   :  { %2349 = vmatpush1.bf16.msra.mxu0 %v2722_v46 }
 0x8ac   :  { %2350 = vmatprep.subr.bf16.mxu0 %v2731_v59 }
 0x8af   :  { %2351 = vmatpush1.bf16.msra.mxu0 %v2730_v62 }
 0x8b0   :  { %2352 = vmatprep.subr.bf16.mxu0 %v2739_v63 }
 0x8b3   :  { %2353 = vmatpush1.bf16.msra.mxu0 %v2738_v0 }
 0x8b6   :  { %2743 = vmatmul.mubr.msk.bf16.vlgmr.msra.gmra.mrb[24].mxu0 %vm1911_vm11, %v3790_v22 }
 0x909   :  { %v2489_v51 = vpop.permute.xlu1 %2488 }
 0x90a   :  { %v2491_v35 = vsel %vm883_vm3, %v2489_v51, 0.0 }
 0x90b   :  { %2492 = vadd.xlane.f32.xlu0 %v2491_v35 }
 0x969   :  { %v1981_v6 = vpop.f32.mrb[16].mxu0 }
 0x96a   :  { %v2511_v8 = vsub.f32 %v3594_v2, %v1981_v6  ;;  %v2952_v9 = vpop.f32.mrb[17].mxu0  ;;  %v2046_v6 = vsub.s32 6, %v3416_v33 }
 0x96b   :  { %v2257_v10 = vpop.f32.mrb[24].mxu1 }
 0x96c   :  { %v2512_v12 = vmul.f32 %v2511_v8, %v2511_v8  ;;  %v2258_v13 = vadd.f32 %v2257_v10, %v2023_v4  ;;  %v2259_v14 = vpop.f32.mrb[25].mxu1  ;;  %v2047_v10 = vrot.slane %v3858_v3, %v2046_v6 }
 0x96d   :  { %v2260_v17 = vadd.f32 %v2259_v14, %v2027_v7  ;;  %v2261_v18 = vpop.f32.mrb[26].mxu1  ;;  %v2050_v7 = vsub.s32 7, %v3416_v33 }
 0x96e   :  { %v2433_v19 = vsub.f32 %v2258_v13, %v3431_v42  ;;  %v2262_v21 = vpop.f32.mrb[27].mxu1  ;;  %v2513_v22 = vsel %vm881_vm2, %v2512_v12, 0.0  ;;  %v2038_v42 = vsub.s32 4, %v3416_v33 }
 0x96f   :  { %v2395_v23 = vcombine.low %v2258_v13, %v2260_v17  ;;  %v2434_v24 = vsub.f32 %v2260_v17, %v3438_v44  ;;  %2514 = vadd.xlane.f32.xlu1 %v2513_v22  ;;  %v2035_v44 = vrot.slane %v3858_v3, %v2034_v29  ;;  %v2051_v12 = vrot.slane %v3858_v3, %v2050_v7 }
 0x970   :  { %v2441_v30 = vmul.f32 %v2433_v19, %v2433_v19  ;;  %v2039_v36 = vrot.slane %v3858_v3, %v2038_v42 }
 0x971   :  { %v2442_v25 = vmul.f32 %v2434_v24, %v2434_v24  ;;  %v2403_v46 = vrot.slane %v2395_v23, %v3428_v41 }
 0x972   :  { %v2450_v2 = vsel %vm2449_vm12, %v2441_v30, 0.0 }
 0x973   :  { %v2451_v27 = vsel %vm2449_vm12, %v2442_v25, 0.0 }
 0x974   :  { %v2452_v31 = vadd.f32 %v2451_v27, %v2450_v2 }
 0x979   :  { %v2298_v37 = vpop.f32.mrb[20].mxu0 }
 0x97a   :  { %v2299_v39 = vadd.f32 %v2298_v37, %v2031_v34  ;;  %v2300_v40 = vpop.f32.mrb[21].mxu0 }
 0x97b   :  { %v2301_v47 = vadd.f32 %v2300_v40, %v2035_v44  ;;  %v2302_v48 = vpop.f32.mrb[22].mxu0  ;;  %v2339_v49 = vpop.f32.mrb[28].mxu1 }
 0x97c   :  { %v2435_v50 = vsub.f32 %v2299_v39, %v3434_v43  ;;  %v2340_v52 = vadd.f32 %v2339_v49, %v2039_v36  ;;  %v2303_v53 = vpop.f32.mrb[23].mxu0  ;;  %v2341_v54 = vpop.f32.mrb[29].mxu1 }
 0x97d   :  { %v2396_v55 = vcombine.low %v2299_v39, %v2301_v47  ;;  %v2436_v56 = vsub.f32 %v2301_v47, %v3442_v45  ;;  %v2342_v57 = vadd.f32 %v2341_v54, %v2043_v38  ;;  %v2343_v58 = vpop.f32.mrb[30].mxu1 }
 0x97e   :  { %v2443_v59 = vmul.f32 %v2435_v50, %v2435_v50  ;;  %v2437_v60 = vsub.f32 %v2340_v52, %v3528_v11  ;;  %v2344_v61 = vpop.f32.mrb[31].mxu1 }
 0x97f   :  { %v2410_v62 = vrot.slane %v2396_v55, %v3428_v41  ;;  %v2444_v63 = vmul.f32 %v2436_v56, %v2436_v56  ;;  %v2412_v0 = vcombine.low %v2340_v52, %v2342_v57  ;;  %v2438_v43 = vsub.f32 %v2342_v57, %v3538_v15 }
 0x980   :  { %v2453_v51 = vsel %vm2449_vm12, %v2443_v59, 0.0  ;;  %v2445_v35 = vmul.f32 %v2437_v60, %v2437_v60 }
 0x981   :  { %v2454_v1 = vadd.f32 %v2453_v51, %v2452_v31  ;;  %v2411_v28 = vcombine.low %v2403_v46, %v2410_v62  ;;  %v2455_v45 = vsel %vm2449_vm12, %v2444_v63, 0.0  ;;  %v2446_v4 = vmul.f32 %v2438_v43, %v2438_v43 }
 0x982   :  { %v2457_v8 = vsel %vm2449_vm12, %v2445_v35, 0.0  ;;  %v2420_v25 = vrot.slane %v2412_v0, %v3428_v41 }
 0x983   :  { %2431 = vst [vmem:[%s4000_s10] sm:$0xff] %v2411_v28  ;;  %v2456_v11 = vadd.f32 %v2455_v45, %v2454_v1  ;;  %v2459_v9 = vsel %vm2449_vm12, %v2446_v4, 0.0 }
 0x985   :  { %v2458_v15 = vadd.f32 %v2457_v8, %v2456_v11 }
 0x987   :  { %v2460_v13 = vadd.f32 %v2459_v9, %v2458_v15 }
 0x989   :  { %v2380_v14 = vpop.f32.mrb[24].mxu0 }
 0x98a   :  { %v2381_v17 = vadd.f32 %v2380_v14, %v2047_v10  ;;  %v2382_v18 = vpop.f32.mrb[25].mxu0 }
 0x98b   :  { %v2383_v19 = vadd.f32 %v2382_v18, %v2051_v12  ;;  %v2384_v21 = vpop.f32.mrb[26].mxu0 }
 0x98c   :  { %v2439_v22 = vsub.f32 %v2381_v17, %v3541_v16  ;;  %v2385_v23 = vpop.f32.mrb[27].mxu0 }
 0x98d   :  { %v2413_v24 = vcombine.low %v2381_v17, %v2383_v19  ;;  %v2440_v33 = vsub.f32 %v2383_v19, %v3553_v20 }
 0x98e   :  { %v2447_v30 = vmul.f32 %v2439_v22, %v2439_v22 }
 0x98f   :  { %v2427_v2 = vrot.slane %v2413_v24, %v3428_v41  ;;  %v2448_v26 = vmul.f32 %v2440_v33, %v2440_v33 }
 0x990   :  { %v2461_v3 = vsel %vm2449_vm12, %v2447_v30, 0.0 }
 0x991   :  { %v2428_v27 = vcombine.low %v2420_v25, %v2427_v2  ;;  %v2462_v29 = vadd.f32 %v2461_v3, %v2460_v13  ;;  %v2463_v31 = vsel %vm2449_vm12, %v2448_v26, 0.0 }
 0x993   :  { %2432 = vst [vmem:[%s4000_s10 + $0x8] sm:$0xff] %v2428_v27  ;;  %v2464_v16 = vadd.f32 %v2463_v31, %v2462_v29  ;;  %s3222_s10 = smov [#allocation5]  }
 0x995   :  { %2465 = vadd.xlane.f32.xlu0 %v2464_v16 }
 0x998   :  { %v2493_v42 = vpop.xlane.xlu0 %2492 }
 0x999   :  { %v2494_v20 = vmul.f32 -0.5, %v2493_v42 }
 0x99b   :  { %v2496_v32 = vsel %vm2495_vm13, %v2494_v20, 0.0 }
 0x99c   :  { %2497 = vadd.xlane.f32.xlu0 %v2496_v32 }
 0x9b2   :  { %886 = vrot.lane.b32.xlu0 %v3605_v5, %s3207_s5  ;;  %s2551_s5 = sshll.u32 %s3222_s10, 4  ;;  %s2552_s5 = int_to_ptr.vmem [resolvable:$true] %s2551_s5 }
 0x9b3   :  { %s3074_s6 = scalar_lea.vmem %s2552_s5, 32  ;;  %p3079_p1 = scmp.lt.s32.totalorder %s2552_s5, %s2552_s5 }
 0x9b4   :  { %p3075_p0 = scmp.ne.s32.totalorder %s2552_s5, %s3074_s6  ;;  %p3080_p2 = scmp.lt.s32.totalorder %s3074_s6, %s3074_s6 }
 0x9b6   :  { %p3081_p3 = por %p3080_p2, %p3079_p1 }
 0x9b8   :  { %p3082_p4 = pnand %p3081_p3, %p3075_p0 }
 0x9fc   :  { %v2515_v41 = vpop.xlane.xlu1 %2514 }
 0x9fd   :  { %v2516_v34 = vsel %vm2495_vm13, %v2515_v41, 0.0 }
 0x9fe   :  { %2517 = vadd.xlane.f32.xlu1 %v2516_v34 }
 0xa22   :  { %v2466_v44 = vpop.xlane.xlu0 %2465 }
 0xa23   :  { %v2467_v36 = vrot.slane %v2466_v44, 4 }
 0xa25   :  { %v2468_v37 = vadd.f32 %v2467_v36, %v2466_v44 }
 0xa27   :  { %v2469_v38 = vrot.slane %v2468_v37, 2 }
 0xa29   :  { %v2498_v39 = vpop.xlane.xlu0 %2497  ;;  %v2470_v40 = vadd.f32 %v2469_v38, %v2468_v37 }
 0xa2a   :  { %v2499_v47 = vrot.slane %v2498_v39, 4 }
 0xa2b   :  { %v2471_v48 = vrot.slane %v2470_v40, 1 }
 0xa2c   :  { %v2500_v49 = vadd.f32 %v2499_v47, %v2498_v39 }
 0xa2d   :  { %v887_v50 = vpop.permute.xlu0 %886  ;;  %v2472_v52 = vadd.f32 %v2471_v48, %v2470_v40 }
 0xa2e   :  { %v2501_v53 = vrot.slane %v2500_v49, 2  ;;  %889 = vst.msk [vmem:[#allocation7] sm:$0x3] %vm883_vm3, %v887_v50 }
 0xa2f   :  { %2971 = vpush %v2472_v52 }
 0xa30   :  { %v2502_v54 = vadd.f32 %v2501_v53, %v2500_v49 }
 0xa32   :  { %v2503_v5 = vrot.slane %v2502_v54, 1 }
 0xa34   :  { %v2504_v55 = vadd.f32 %v2503_v5, %v2502_v54 }
 0xa36   :  { %2973 = vpush %v2504_v55 }
 0xa37   :  { %3085 = shalt.err (!%p3082_p4)
}
 0xa38   :  { %s3086_s26 = scalar_lea.hbm %s4002_s12, 32 }
 0xa39   :  { %p3087_p5 = scmp.ne.s32.totalorder %s4002_s12, %s3086_s26  ;;  %p3090_p6 = scmp.lt.u32.totalorder %s3086_s26, %s4002_s12 }
 0xa3b   :  { %p3092_p7 = pnand %p3090_p6, %p3087_p5 }
 0xa3d   :  { %3095 = shalt.err (!%p3092_p7)
}
 0xa3e   :  { %2554 = dma.vmem_to_hbm [thread:$0]  %s2552_s5, 32, %s4002_s12, [#allocation6]  }
 0xa3f   :  { %s3223_s0 = smov [#allocation2]   ;;  %s3224_s1 = smov [#allocation7]  }
 0xa40   :  { %s2541_s19 = sshll.u32 %s3223_s0, 4  ;;  %s2561_s4 = sshll.u32 %s3224_s1, 4  ;;  %s2542_s19 = int_to_ptr.vmem [resolvable:$true] %s2541_s19  ;;  %s2562_s4 = int_to_ptr.vmem [resolvable:$true] %s2561_s4 }
 0xa41   :  { %s3096_s21 = scalar_lea.vmem %s2542_s19, 32  ;;  %p3101_p9 = scmp.lt.s32.totalorder %s2542_s19, %s2542_s19 }
 0xa42   :  { %p3097_p8 = scmp.ne.s32.totalorder %s2542_s19, %s3096_s21  ;;  %p3102_p10 = scmp.lt.s32.totalorder %s3096_s21, %s3096_s21 }
 0xa44   :  { %p3103_p11 = por %p3102_p10, %p3101_p9 }
 0xa46   :  { %p3104_p12 = pnand %p3103_p11, %p3097_p8 }
 0xa48   :  { %3107 = shalt.err (!%p3104_p12)
}
 0xa49   :  { %s3108_s22 = scalar_lea.hbm %s4001_s11, 32 }
 0xa4a   :  { %p3109_p13 = scmp.ne.s32.totalorder %s4001_s11, %s3108_s22  ;;  %p3112_p0 = scmp.lt.u32.totalorder %s3108_s22, %s4001_s11 }
 0xa4c   :  { %p3114_p1 = pnand %p3112_p0, %p3109_p13 }
 0xa4e   :  { %3117 = shalt.err (!%p3114_p1)
}
 0xa4f   :  { %2544 = dma.vmem_to_hbm [thread:$0]  %s2542_s19, 32, %s4001_s11, [#allocation3]  }
 0xa50   :  { %s3118_s5 = scalar_lea.vmem %s2562_s4, 32  ;;  %p3123_p3 = scmp.lt.s32.totalorder %s2562_s4, %s2562_s4 }
 0xa51   :  { %p3119_p2 = scmp.ne.s32.totalorder %s2562_s4, %s3118_s5  ;;  %p3124_p4 = scmp.lt.s32.totalorder %s3118_s5, %s3118_s5 }
 0xa53   :  { %p3125_p5 = por %p3124_p4, %p3123_p3 }
 0xa55   :  { %p3126_p6 = pnand %p3125_p5, %p3119_p2 }
 0xa57   :  { %3129 = shalt.err (!%p3126_p6)
}
 0xa58   :  { %s3130_s7 = scalar_lea.hbm %s4003_s13, 32 }
 0xa59   :  { %p3131_p7 = scmp.ne.s32.totalorder %s4003_s13, %s3130_s7  ;;  %p3134_p8 = scmp.lt.u32.totalorder %s3130_s7, %s4003_s13 }
 0xa5b   :  { %p3136_p9 = pnand %p3134_p8, %p3131_p7 }
 0xa5d   :  { %3139 = shalt.err (!%p3136_p9)
}
 0xa5e   :  { %2564 = dma.vmem_to_hbm [thread:$0]  %s2562_s4, 32, %s4003_s13, [#allocation6]  }
 0xa5f   :  { %s3225_s30 = smov [#allocation8]  }
 0xa60   :  { %s2571_s18 = sshll.u32 %s3225_s30, 4  ;;  %s2572_s18 = int_to_ptr.vmem [resolvable:$true] %s2571_s18 }
 0xa61   :  { %s3140_s0 = scalar_lea.vmem %s2572_s18, 32  ;;  %p3145_p11 = scmp.lt.s32.totalorder %s2572_s18, %s2572_s18 }
 0xa62   :  { %p3141_p10 = scmp.ne.s32.totalorder %s2572_s18, %s3140_s0  ;;  %p3146_p12 = scmp.lt.s32.totalorder %s3140_s0, %s3140_s0 }
 0xa64   :  { %p3147_p13 = por %p3146_p12, %p3145_p11 }
 0xa66   :  { %p3148_p0 = pnand %p3147_p13, %p3141_p10 }
 0xa68   :  { %3151 = shalt.err (!%p3148_p0)
}
 0xa69   :  { %s3152_s21 = scalar_lea.hbm %s4004_s14, 32 }
 0xa6a   :  { %p3153_p1 = scmp.ne.s32.totalorder %s4004_s14, %s3152_s21  ;;  %p3156_p2 = scmp.lt.u32.totalorder %s3152_s21, %s4004_s14 }
 0xa6c   :  { %p3158_p3 = pnand %p3156_p2, %p3153_p1 }
 0xa6e   :  { %3161 = shalt.err (!%p3158_p3)
}
 0xa6f   :  { %2574 = dma.vmem_to_hbm [thread:$0]  %s2572_s18, 32, %s4004_s14, [#allocation9]  }
 0xa70   :  { %s2972_s9 = spop %2971  ;;  %s3162_s10 = scalar_lea.hbm %s4005_s15, 16 }
 0xa71   :  { %s2474_s12 = smul.f32 0.5, %s2972_s9  ;;  %p3163_p4 = scmp.ne.s32.totalorder %s4005_s15, %s3162_s10 }
 0xa72   :  { %p3166_p5 = scmp.lt.u32.totalorder %s3162_s10, %s4005_s15 }
 0xa73   :  { %2476 = sst [smem:[#allocation10]] %s2474_s12 }
 0xa74   :  { %p3168_p6 = pnand %p3166_p5, %p3163_p4 }
 0xa76   :  { %3171 = shalt.err (!%p3168_p6)
}
 0xa77   :  { %s3226_s26 = smov [#allocation10]   ;;  %s2974_s27 = spop %2973 }
 0xa78   :  { %2582 = dma.smem_to_hbm %s3226_s26, 16, %s4005_s15, [#allocation4]  }
 0xa79   :  { %s2508_s28 = smul.f32 0.5, %s2974_s27  ;;  %s3172_s30 = scalar_lea.hbm %s4006_s16, 16 }
 0xa7a   :  { %p3173_p7 = scmp.ne.s32.totalorder %s4006_s16, %s3172_s30  ;;  %p3176_p8 = scmp.lt.u32.totalorder %s3172_s30, %s4006_s16 }
 0xa7b   :  { %2510 = sst [smem:[#allocation11]] %s2508_s28 }
 0xa7c   :  { %p3178_p9 = pnand %p3176_p8, %p3173_p7 }
 0xa7e   :  { %3181 = shalt.err (!%p3178_p9)
}
 0xa7f   :  { %s3227_s21 = smov [#allocation11]   ;;  %s3182_s12 = scalar_lea.hbm %s4007_s17, 16 }
 0xa80   :  { %2590 = dma.smem_to_hbm %s3227_s21, 16, %s4006_s16, [#allocation12]  }
 0xa81   :  { %p3183_p10 = scmp.ne.s32.totalorder %s4007_s17, %s3182_s12  ;;  %p3186_p11 = scmp.lt.u32.totalorder %s3182_s12, %s4007_s17 }
 0xa83   :  { %p3188_p12 = pnand %p3186_p11, %p3183_p10 }
 0xa8b   :  { %v2518_v56 = vpop.xlane.xlu1 %2517 }
 0xa8c   :  { %v2519_v57 = vrot.slane %v2518_v56, 4 }
 0xa8e   :  { %v2520_v58 = vadd.f32 %v2519_v57, %v2518_v56 }
 0xa90   :  { %v2521_v46 = vrot.slane %v2520_v58, 2 }
 0xa92   :  { %v2522_v59 = vadd.f32 %v2521_v46, %v2520_v58 }
 0xa94   :  { %v2523_v60 = vrot.slane %v2522_v59, 1 }
 0xa96   :  { %v2524_v61 = vadd.f32 %v2523_v60, %v2522_v59 }
 0xa98   :  { %2975 = vpush %v2524_v61 }
 0xac9   :  { %s2976_s20 = spop %2975 }
 0xaca   :  { %s2528_s22 = smul.f32 0.5, %s2976_s20 }
 0xacc   :  { %s2529_s13 = smul.f32 0.1, %s2528_s22 }
 0xace   :  { %s2530_s4 = sadd.f32 0.8641803, %s2529_s13 }
 0xad0   :  { %2532 = sst [smem:[#allocation13]] %s2530_s4 }
 0xad1   :  { %3191 = shalt.err (!%p3188_p12)
}
 0xad2   :  { %s3228_s5 = smov [#allocation13]  }
 0xad3   :  { %2598 = dma.smem_to_hbm %s3228_s5, 16, %s4007_s17, [#allocation12]  }
 0xad4   :  { %3192 = dma.done.wait [#allocation3], 32  }
 0xad5   :  { %3193 = vsyncadd [#allocation3], 4294967264 }
 0xad6   :  { %3194 = dma.done.wait [#allocation6], 64  }
 0xad7   :  { %3195 = vsyncadd [#allocation6], 4294967232 }
 0xad8   :  { %3196 = dma.done.wait [#allocation9], 32  }
 0xad9   :  { %3197 = vsyncadd [#allocation9], 4294967264 }
 0xada   :  { %3198 = dma.done.wait [#allocation4], 16  }
 0xadb   :  { %3199 = vsyncadd [#allocation4], 4294967280 }
 0xadc   :  { %3200 = dma.done.wait [#allocation12], 32  }
 0xadd   :  { %3201 = vsyncadd [#allocation12], 4294967264 }
 0xade   :  { %2622 = sfence }
 0xadf   :  { %2623 = vsyncpa [#allocation3], 1 }
 0xae0   :  { %2624 = vsyncpa [#allocation6], 1 }
 0xae1   :  { %2625 = vsyncpa [#allocation9], 1 }
 0xae2   :  { %2626 = vsyncpa [#allocation4], 1 }
 0xae3   :  { %2627 = vsyncpa [#allocation12], 1 }

</bundles_post_ra>
